<compile_context>
chip_gen: v7x
topology: tpu7x:2x2x1
jax: 0.10.0
libtpu: 0.0.40
codegen_flags: <defaults>
</compile_context>

<pallas_src>
import functools

import jax
import jax.numpy as jnp
from jax.experimental import pallas as pl
from jax.experimental.pallas import tpu as pltpu

F_COEFFI = -1.0  # self.f_coeffi in the PyTorch module
HIDDEN = 256


def _round_up(n, m):
    return (n + m - 1) // m * m


def _odefunc_kernel(x_ref, w1_ref, b1_ref, w2_ref, b2_ref, w3_ref, b3_ref, o_ref):
    """Fused 3-layer MLP with sin activations.

    x_ref : (tm, D_pad)           bf16 batch tile
    w*_ref: (D_pad, 256), (256, 256), (256, D_pad)   bf16 weights (f_coeffi folded in)
    b*_ref: (1, 256), (1, 256), (1, D_pad)           f32 biases   (f_coeffi folded in)
    o_ref : (tm, D_pad)           f32 output tile
    """
    x = x_ref[...]  # bf16

    # layer 1: sin(x @ W1' + b1')   (W1' = -W1, b1' = -b1  -> matches sin(-(xW+b)))
    h = jnp.dot(x, w1_ref[...], preferred_element_type=jnp.float32) + b1_ref[...]
    h = jnp.sin(h)

    # layer 2
    h = jnp.dot(h.astype(jnp.bfloat16), w2_ref[...],
                preferred_element_type=jnp.float32) + b2_ref[...]
    h = jnp.sin(h)

    # layer 3
    h = jnp.dot(h.astype(jnp.bfloat16), w3_ref[...],
                preferred_element_type=jnp.float32) + b3_ref[...]
    o_ref[...] = jnp.sin(h).astype(o_ref.dtype)


@functools.partial(jax.jit, static_argnames=("block_m",))
def odefunc_mlp_forward(x, w1, b1, w2, b2, w3, b3, *, block_m=256):
    """Pallas launch wrapper. x: (B, D_in) float32, weights stored (in, out)."""
    B, D_in = x.shape

    # Lane-dense feature dim (multiple of 128) and batch padded to the tile.
    D_pad = _round_up(max(D_in, 128), 128)
    tm = min(block_m, _round_up(B, 8))       # don't make the tile exceed the batch
    B_pad = _round_up(B, tm)
    grid = (B_pad // tm,)

    # Fold f_coeffi = -1 into the affine layers:  sin(-(xW+b)) == sin(x(-W) + (-b)).
    w1n, b1n = -w1, -b1
    w2n, b2n = -w2, -b2
    w3n, b3n = -w3, -b3

    # Zero-pad feature dims (zeros contribute nothing to the matmuls).
    w1p = jnp.zeros((D_pad, HIDDEN), jnp.float32).at[:D_in, :].set(w1n)
    w3p = jnp.zeros((HIDDEN, D_pad), jnp.float32).at[:, :D_in].set(w3n)
    b3p = jnp.zeros((D_pad,), jnp.float32).at[:D_in].set(b3n)

    # bf16 matmul operands, f32 biases.
    xp = jnp.zeros((B_pad, D_pad), jnp.bfloat16).at[:B, :D_in].set(
        x.astype(jnp.bfloat16))
    w1b = w1p.astype(jnp.bfloat16)
    w2b = w2n.astype(jnp.bfloat16)
    w3b = w3p.astype(jnp.bfloat16)
    b1_2d = b1n.reshape(1, HIDDEN).astype(jnp.float32)
    b2_2d = b2n.reshape(1, HIDDEN).astype(jnp.float32)
    b3_2d = b3p.reshape(1, D_pad).astype(jnp.float32)

    flops = 2 * B_pad * (D_pad * HIDDEN + HIDDEN * HIDDEN + HIDDEN * D_pad)
    transcendentals = B_pad * (HIDDEN + HIDDEN + D_pad)
    bytes_accessed = (
        B_pad * D_pad * 2                       # x (bf16)
        + (D_pad * HIDDEN + HIDDEN * HIDDEN + HIDDEN * D_pad) * 2   # weights (bf16)
        + (HIDDEN + HIDDEN + D_pad) * 4         # biases (f32)
        + B_pad * D_pad * 4                     # output (f32)
    )

    out = pl.pallas_call(
        _odefunc_kernel,
        out_shape=jax.ShapeDtypeStruct((B_pad, D_pad), jnp.float32),
        grid_spec=pltpu.PrefetchScalarGridSpec(
            num_scalar_prefetch=0,
            grid=grid,
            in_specs=[
                pl.BlockSpec((tm, D_pad), lambda i: (i, 0)),       # x tile
                pl.BlockSpec((D_pad, HIDDEN), lambda i: (0, 0)),   # W1 (full, grid-invariant)
                pl.BlockSpec((1, HIDDEN), lambda i: (0, 0)),       # b1
                pl.BlockSpec((HIDDEN, HIDDEN), lambda i: (0, 0)),  # W2
                pl.BlockSpec((1, HIDDEN), lambda i: (0, 0)),       # b2
                pl.BlockSpec((HIDDEN, D_pad), lambda i: (0, 0)),   # W3
                pl.BlockSpec((1, D_pad), lambda i: (0, 0)),        # b3
            ],
            out_specs=pl.BlockSpec((tm, D_pad), lambda i: (i, 0)),
        ),
        compiler_params=pltpu.CompilerParams(
            dimension_semantics=("parallel",),
        ),
        cost_estimate=pl.CostEstimate(
            flops=flops,
            transcendentals=transcendentals,
            bytes_accessed=bytes_accessed,
        ),
    )(xp, w1b, b1_2d, w2b, b2_2d, w3b, b3_2d)

    # Strip batch / feature padding.
    return out[:B, :D_in].astype(x.dtype)


def init_params(key, input_size):
    """Deterministic init mimicking nn.Linear's U(-1/sqrt(fan_in), 1/sqrt(fan_in)).

    Weights are stored as (in_features, out_features) for x @ W.
    """
    ks = jax.random.split(key, 6)

    def linear(kw, kb, fan_in, fan_out):
        bound = 1.0 / jnp.sqrt(jnp.float32(fan_in))
        w = jax.random.uniform(kw, (fan_in, fan_out), jnp.float32, -bound, bound)
        b = jax.random.uniform(kb, (fan_out,), jnp.float32, -bound, bound)
        return w, b

    w1, b1 = linear(ks[0], ks[1], input_size, HIDDEN)
    w2, b2 = linear(ks[2], ks[3], HIDDEN, HIDDEN)
    w3, b3 = linear(ks[4], ks[5], HIDDEN, input_size)
    return w1, b1, w2, b2, w3, b3


def reference_forward(x, w1, b1, w2, b2, w3, b3):
    """Pure-JAX f32 reference matching the PyTorch module exactly."""
    h = jnp.sin(F_COEFFI * (x @ w1 + b1))
    h = jnp.sin(F_COEFFI * (h @ w2 + b2))
    h = jnp.sin(F_COEFFI * (h @ w3 + b3))
    return h


if __name__ == "__main__":
    key = jax.random.PRNGKey(0)
    k_params, k_x = jax.random.split(key)

    batch = 16         # small demo batch; wrapper pads/tiles it
    input_size = 64    # flat feature dim; wrapper lane-pads to 128

    params = init_params(k_params, input_size)
    x = jax.random.normal(k_x, (batch, input_size), jnp.float32)

    out = odefunc_mlp_forward(x, *params, block_m=256)
    out = jax.block_until_ready(out)

    ref = reference_forward(x, *params)
    assert out.shape == (batch, input_size)
    # bf16 matmul inputs with f32 accumulation -> slightly looser tolerance.
    assert jnp.allclose(out, ref, atol=3e-2, rtol=0.0), "mismatch vs reference"

    print("KERNEL_OK")
</pallas_src>

<mosaic_0001>
module attributes {stable_mosaic.version = 11 : i64} {
  func.func @_odefunc_kernel(%arg0: i32, %arg1: memref<16x128xbf16, #tpu.memory_space<vmem>>, %arg2: memref<128x256xbf16, #tpu.memory_space<vmem>>, %arg3: memref<1x256xf32, #tpu.memory_space<vmem>>, %arg4: memref<256x256xbf16, #tpu.memory_space<vmem>>, %arg5: memref<1x256xf32, #tpu.memory_space<vmem>>, %arg6: memref<256x128xbf16, #tpu.memory_space<vmem>>, %arg7: memref<1x128xf32, #tpu.memory_space<vmem>>, %arg8: memref<16x128xf32, #tpu.memory_space<vmem>>) attributes {dimension_semantics = [#tpu.dimension_semantics<parallel>], iteration_bounds = array<i64: 1>, scalar_prefetch = 0 : i64, scratch_operands = 0 : i64, tpu.core_type = #tpu.core_type<tc>, window_params = [{transform_indices = @transform_0, window_bounds = array<i64: 16, 128>}, {pipeline_mode = #tpu.pipeline_mode<synchronous>, transform_indices = @transform_1, window_bounds = array<i64: 128, 256>}, {pipeline_mode = #tpu.pipeline_mode<synchronous>, transform_indices = @transform_2, window_bounds = array<i64: 1, 256>}, {pipeline_mode = #tpu.pipeline_mode<synchronous>, transform_indices = @transform_3, window_bounds = array<i64: 256, 256>}, {pipeline_mode = #tpu.pipeline_mode<synchronous>, transform_indices = @transform_4, window_bounds = array<i64: 1, 256>}, {pipeline_mode = #tpu.pipeline_mode<synchronous>, transform_indices = @transform_5, window_bounds = array<i64: 256, 128>}, {pipeline_mode = #tpu.pipeline_mode<synchronous>, transform_indices = @transform_6, window_bounds = array<i64: 1, 128>}, {transform_indices = @transform_7, window_bounds = array<i64: 16, 128>}]} {
    %c0 = arith.constant 0 : index
    %c0_0 = arith.constant 0 : index
    %0 = vector.load %arg1[%c0, %c0_0] : memref<16x128xbf16, #tpu.memory_space<vmem>>, vector<16x128xbf16>
    %c0_1 = arith.constant 0 : index
    %c0_2 = arith.constant 0 : index
    %1 = vector.load %arg2[%c0_1, %c0_2] : memref<128x256xbf16, #tpu.memory_space<vmem>>, vector<128x256xbf16>
    %cst = arith.constant dense<0.000000e+00> : vector<16x256xf32>
    %2 = tpu.matmul %0, %1, %cst {dimension_numbers = #tpu.dot_dimension_numbers<[1], [0], [0], [1], [0, 0, 1, 1], [], []>} : vector<16x128xbf16>, vector<128x256xbf16>, vector<16x256xf32> -> vector<16x256xf32>
    %c0_3 = arith.constant 0 : index
    %c0_4 = arith.constant 0 : index
    %3 = vector.load %arg3[%c0_3, %c0_4] : memref<1x256xf32, #tpu.memory_space<vmem>>, vector<1x256xf32>
    %4 = vector.broadcast %3 : vector<1x256xf32> to vector<16x256xf32>
    %5 = arith.addf %2, %4 : vector<16x256xf32>
    %6 = math.sin %5 : vector<16x256xf32>
    %7 = arith.truncf %6 : vector<16x256xf32> to vector<16x256xbf16>
    %c0_5 = arith.constant 0 : index
    %c0_6 = arith.constant 0 : index
    %8 = vector.load %arg4[%c0_5, %c0_6] : memref<256x256xbf16, #tpu.memory_space<vmem>>, vector<256x256xbf16>
    %cst_7 = arith.constant dense<0.000000e+00> : vector<16x256xf32>
    %9 = tpu.matmul %7, %8, %cst_7 {dimension_numbers = #tpu.dot_dimension_numbers<[1], [0], [0], [1], [0, 0, 1, 1], [], []>} : vector<16x256xbf16>, vector<256x256xbf16>, vector<16x256xf32> -> vector<16x256xf32>
    %c0_8 = arith.constant 0 : index
    %c0_9 = arith.constant 0 : index
    %10 = vector.load %arg5[%c0_8, %c0_9] : memref<1x256xf32, #tpu.memory_space<vmem>>, vector<1x256xf32>
    %11 = vector.broadcast %10 : vector<1x256xf32> to vector<16x256xf32>
    %12 = arith.addf %9, %11 : vector<16x256xf32>
    %13 = math.sin %12 : vector<16x256xf32>
    %14 = arith.truncf %13 : vector<16x256xf32> to vector<16x256xbf16>
    %c0_10 = arith.constant 0 : index
    %c0_11 = arith.constant 0 : index
    %15 = vector.load %arg6[%c0_10, %c0_11] : memref<256x128xbf16, #tpu.memory_space<vmem>>, vector<256x128xbf16>
    %cst_12 = arith.constant dense<0.000000e+00> : vector<16x128xf32>
    %16 = tpu.matmul %14, %15, %cst_12 {dimension_numbers = #tpu.dot_dimension_numbers<[1], [0], [0], [1], [0, 0, 1, 1], [], []>} : vector<16x256xbf16>, vector<256x128xbf16>, vector<16x128xf32> -> vector<16x128xf32>
    %c0_13 = arith.constant 0 : index
    %c0_14 = arith.constant 0 : index
    %17 = vector.load %arg7[%c0_13, %c0_14] : memref<1x128xf32, #tpu.memory_space<vmem>>, vector<1x128xf32>
    %18 = vector.broadcast %17 : vector<1x128xf32> to vector<16x128xf32>
    %19 = arith.addf %16, %18 : vector<16x128xf32>
    %20 = math.sin %19 : vector<16x128xf32>
    %c0_15 = arith.constant 0 : index
    %c0_16 = arith.constant 0 : index
    %21 = vector.load %arg8[%c0_15, %c0_16] : memref<16x128xf32, #tpu.memory_space<vmem>>, vector<16x128xf32>
    tpu.vector_store %arg8[%c0_15, %c0_16], %20 {strides = array<i32>} : memref<16x128xf32, #tpu.memory_space<vmem>>, vector<16x128xf32>,
    return
  }
  func.func @transform_0(%arg0: i32) -> (i32, i32) {
    %c0_i32 = arith.constant 0 : i32
    %c0_i32_0 = arith.constant 0 : i32
    return %arg0, %c0_i32 : i32, i32
  }
  func.func @transform_1(%arg0: i32) -> (i32, i32) {
    %c0_i32 = arith.constant 0 : i32
    %c0_i32_0 = arith.constant 0 : i32
    %c0_i32_1 = arith.constant 0 : i32
    return %c0_i32, %c0_i32_0 : i32, i32
  }
  func.func @transform_2(%arg0: i32) -> (i32, i32) {
    %c0_i32 = arith.constant 0 : i32
    %c0_i32_0 = arith.constant 0 : i32
    %c0_i32_1 = arith.constant 0 : i32
    return %c0_i32, %c0_i32_0 : i32, i32
  }
  func.func @transform_3(%arg0: i32) -> (i32, i32) {
    %c0_i32 = arith.constant 0 : i32
    %c0_i32_0 = arith.constant 0 : i32
    %c0_i32_1 = arith.constant 0 : i32
    return %c0_i32, %c0_i32_0 : i32, i32
  }
  func.func @transform_4(%arg0: i32) -> (i32, i32) {
    %c0_i32 = arith.constant 0 : i32
    %c0_i32_0 = arith.constant 0 : i32
    %c0_i32_1 = arith.constant 0 : i32
    return %c0_i32, %c0_i32_0 : i32, i32
  }
  func.func @transform_5(%arg0: i32) -> (i32, i32) {
    %c0_i32 = arith.constant 0 : i32
    %c0_i32_0 = arith.constant 0 : i32
    %c0_i32_1 = arith.constant 0 : i32
    return %c0_i32, %c0_i32_0 : i32, i32
  }
  func.func @transform_6(%arg0: i32) -> (i32, i32) {
    %c0_i32 = arith.constant 0 : i32
    %c0_i32_0 = arith.constant 0 : i32
    %c0_i32_1 = arith.constant 0 : i32
    return %c0_i32, %c0_i32_0 : i32, i32
  }
  func.func @transform_7(%arg0: i32) -> (i32, i32) {
    %c0_i32 = arith.constant 0 : i32
    %c0_i32_0 = arith.constant 0 : i32
    return %arg0, %c0_i32 : i32, i32
  }
}

</mosaic_0001>

<bundles_post_ra>
// kernel: neg.7
= control target key start
LH: loop header
LB: loop body
LE: loop exit
PB: predicated region body
PF: predicated region fallthrough
CT: control target
= control target key end

     0   :  { %s24_s0 = inlined_call_operand.vmem [shape: f32[256], index: 0, kind: input, shape index: {}]   ;;  %s25_s1 = inlined_call_operand.vmem [shape: f32[256], index: 1, kind: output, shape index: {}]  }
   0x1   :  { %v2_v0 = vld [vmem:[%s24_s0] sm:$0x3] }
   0x2   :  { %v5_v1 = vxor.u32 2147483648, %v2_v0 }
   0x4   :  { %7 = vst [vmem:[%s25_s1] sm:$0x3] %v5_v1 }

// kernel: odefunc_mlp_forward.1
= control target key start
LH: loop header
LB: loop body
LE: loop exit
PB: predicated region body
PF: predicated region fallthrough
CT: control target
= control target key end

     0   :  { %v2003_v2 = vmov 0   ;;  %s2929_s0 = inlined_call_operand.vmem [shape: bf16[16,128], index: 0, kind: input, shape index: {}]   ;;  %s2930_s1 = inlined_call_operand.vmem [shape: bf16[128,256], index: 1, kind: input, shape index: {}]   ;;  %s2931_s2 = inlined_call_operand.vmem [shape: f32[1,256], index: 2, kind: input, shape index: {}]   ;;  %s2932_s3 = inlined_call_operand.vmem [shape: bf16[256,256], index: 3, kind: input, shape index: {}]   ;;  %s2933_s4 = inlined_call_operand.vmem [shape: f32[1,256], index: 4, kind: input, shape index: {}]   ;;  %s2934_s5 = inlined_call_operand.vmem [shape: bf16[256,128], index: 5, kind: input, shape index: {}]   ;;  %s2935_s6 = inlined_call_operand.vmem [shape: f32[1,128], index: 6, kind: input, shape index: {}]   ;;  %s2936_s7 = inlined_call_operand.hbm [shape: f32[16,128], index: 7, kind: output, shape index: {}]  }
   0x1   :  { %v1850_v0 = vld [vmem:[%s2930_s1 + $0x4] ss:$8 sps:$4 sm:$0xff]   ;;  %v1852_v1 = vld [vmem:[%s2930_s1] ss:$8 sps:$4 sm:$0xff]   ;;  %176 = vmatprep.mubr.bf16.mxu0 %v2003_v2  ;;  %v1853_v3 = vld [vmem:[%s2930_s1 + $0x14] ss:$8 sps:$4 sm:$0xff]  }
   0x2   :  { %144 = vmatprep.subr.bf16.mxu0 %v1850_v0  ;;  %v1855_v4 = vld [vmem:[%s2930_s1 + $0x10] ss:$8 sps:$4 sm:$0xff]   ;;  %v1856_v5 = vld [vmem:[%s2930_s1 + $0x24] ss:$8 sps:$4 sm:$0xff]   ;;  %v1858_v6 = vld [vmem:[%s2930_s1 + $0x20] ss:$8 sps:$4 sm:$0xff]  }
   0x3   :  { %145 = vmatpush1.bf16.msra.mxu0 %v1852_v1  ;;  %v1859_v7 = vld [vmem:[%s2930_s1 + $0x34] ss:$8 sps:$4 sm:$0xff]   ;;  %v1861_v8 = vld [vmem:[%s2930_s1 + $0x30] ss:$8 sps:$4 sm:$0xff]   ;;  %v1862_v9 = vld [vmem:[%s2930_s1 + $0x44] ss:$8 sps:$4 sm:$0xff]  }
   0x4   :  { %146 = vmatprep.subr.bf16.mxu0 %v1853_v3  ;;  %v1864_v10 = vld [vmem:[%s2930_s1 + $0x40] ss:$8 sps:$4 sm:$0xff]   ;;  %v1865_v11 = vld [vmem:[%s2930_s1 + $0x54] ss:$8 sps:$4 sm:$0xff]   ;;  %v1867_v12 = vld [vmem:[%s2930_s1 + $0x50] ss:$8 sps:$4 sm:$0xff]  }
   0x5   :  { %v1868_v13 = vld [vmem:[%s2930_s1 + $0x64] ss:$8 sps:$4 sm:$0xff]   ;;  %v1870_v14 = vld [vmem:[%s2930_s1 + $0x60] ss:$8 sps:$4 sm:$0xff]   ;;  %v1871_v15 = vld [vmem:[%s2930_s1 + $0x74] ss:$8 sps:$4 sm:$0xff]  }
   0x6   :  { %v1873_v16 = vld [vmem:[%s2930_s1 + $0x70] ss:$8 sps:$4 sm:$0xff]   ;;  %v1874_v17 = vld [vmem:[%s2929_s0] sm:$0xff]  }
   0x7   :  { %147 = vmatpush1.bf16.msra.mxu0 %v1855_v4 }
   0x8   :  { %148 = vmatprep.subr.bf16.mxu0 %v1856_v5 }
   0xb   :  { %149 = vmatpush1.bf16.msra.mxu0 %v1858_v6 }
   0xc   :  { %150 = vmatprep.subr.bf16.mxu0 %v1859_v7 }
   0xf   :  { %151 = vmatpush1.bf16.msra.mxu0 %v1861_v8 }
  0x10   :  { %152 = vmatprep.subr.bf16.mxu0 %v1862_v9 }
  0x13   :  { %153 = vmatpush1.bf16.msra.mxu0 %v1864_v10 }
  0x14   :  { %154 = vmatprep.subr.bf16.mxu0 %v1865_v11 }
  0x17   :  { %155 = vmatpush1.bf16.msra.mxu0 %v1867_v12 }
  0x18   :  { %156 = vmatprep.subr.bf16.mxu0 %v1868_v13 }
  0x1b   :  { %157 = vmatpush1.bf16.msra.mxu0 %v1870_v14 }
  0x1c   :  { %158 = vmatprep.subr.bf16.mxu0 %v1871_v15 }
  0x1f   :  { %159 = vmatpush1.bf16.msra.mxu0 %v1873_v16 }
  0x20   :  { %12 = vsyncpa [#allocation3], 0  ;;  %v1875_v18 = vld [vmem:[%s2932_s3 + $0x4] ss:$8 sps:$4 sm:$0xff]   ;;  %v1877_v19 = vld [vmem:[%s2932_s3] ss:$8 sps:$4 sm:$0xff]   ;;  %v48_v50 = vlaneseq }
  0x21   :  { %809 = vmatprep.subr.bf16.mxu1 %v1875_v18  ;;  %v1878_v20 = vld [vmem:[%s2932_s3 + $0x14] ss:$8 sps:$4 sm:$0xff]   ;;  %v1880_v21 = vld [vmem:[%s2932_s3 + $0x10] ss:$8 sps:$4 sm:$0xff]   ;;  %v1881_v22 = vld [vmem:[%s2932_s3 + $0x24] ss:$8 sps:$4 sm:$0xff]  }
  0x22   :  { %177 = vmatmul.mubr.bf16.vlgmr.msra.gmra.mrb[0].mxu0 %v1874_v17  ;;  %810 = vmatpush1.bf16.msra.mxu1 %v1877_v19  ;;  %v1883_v23 = vld [vmem:[%s2932_s3 + $0x20] ss:$8 sps:$4 sm:$0xff]   ;;  %v1884_v24 = vld [vmem:[%s2932_s3 + $0x34] ss:$8 sps:$4 sm:$0xff]   ;;  %v1886_v25 = vld [vmem:[%s2932_s3 + $0x30] ss:$8 sps:$4 sm:$0xff]  }
  0x23   :  { %811 = vmatprep.subr.bf16.mxu1 %v1878_v20  ;;  %v1887_v26 = vld [vmem:[%s2932_s3 + $0x44] ss:$8 sps:$4 sm:$0xff]   ;;  %v1889_v27 = vld [vmem:[%s2932_s3 + $0x40] ss:$8 sps:$4 sm:$0xff]   ;;  %v1890_v28 = vld [vmem:[%s2932_s3 + $0x54] ss:$8 sps:$4 sm:$0xff]  }
  0x24   :  { %v1892_v29 = vld [vmem:[%s2932_s3 + $0x50] ss:$8 sps:$4 sm:$0xff]   ;;  %v1893_v30 = vld [vmem:[%s2932_s3 + $0x64] ss:$8 sps:$4 sm:$0xff]   ;;  %v1895_v31 = vld [vmem:[%s2932_s3 + $0x60] ss:$8 sps:$4 sm:$0xff]  }
  0x25   :  { %v1896_v32 = vld [vmem:[%s2932_s3 + $0x74] ss:$8 sps:$4 sm:$0xff]   ;;  %v1898_v33 = vld [vmem:[%s2932_s3 + $0x70] ss:$8 sps:$4 sm:$0xff]   ;;  %v1899_v34 = vld [vmem:[%s2932_s3 + $0x84] ss:$8 sps:$4 sm:$0xff]  }
  0x26   :  { %812 = vmatpush1.bf16.msra.mxu1 %v1880_v21  ;;  %v1901_v35 = vld [vmem:[%s2932_s3 + $0x80] ss:$8 sps:$4 sm:$0xff]   ;;  %v1902_v36 = vld [vmem:[%s2932_s3 + $0x94] ss:$8 sps:$4 sm:$0xff]   ;;  %v1904_v37 = vld [vmem:[%s2932_s3 + $0x90] ss:$8 sps:$4 sm:$0xff]  }
  0x27   :  { %813 = vmatprep.subr.bf16.mxu1 %v1881_v22  ;;  %v1905_v38 = vld [vmem:[%s2932_s3 + $0xa4] ss:$8 sps:$4 sm:$0xff]   ;;  %v1907_v39 = vld [vmem:[%s2932_s3 + $0xa0] ss:$8 sps:$4 sm:$0xff]   ;;  %v1908_v40 = vld [vmem:[%s2932_s3 + $0xb4] ss:$8 sps:$4 sm:$0xff]  }
  0x28   :  { %v1910_v41 = vld [vmem:[%s2932_s3 + $0xb0] ss:$8 sps:$4 sm:$0xff]   ;;  %v1911_v42 = vld [vmem:[%s2932_s3 + $0xc4] ss:$8 sps:$4 sm:$0xff]   ;;  %v1913_v43 = vld [vmem:[%s2932_s3 + $0xc0] ss:$8 sps:$4 sm:$0xff]  }
  0x29   :  { %v1914_v44 = vld [vmem:[%s2932_s3 + $0xd4] ss:$8 sps:$4 sm:$0xff]   ;;  %v1916_v45 = vld [vmem:[%s2932_s3 + $0xd0] ss:$8 sps:$4 sm:$0xff]   ;;  %v1917_v46 = vld [vmem:[%s2932_s3 + $0xe4] ss:$8 sps:$4 sm:$0xff]  }
  0x2a   :  { %814 = vmatpush1.bf16.msra.mxu1 %v1883_v23  ;;  %v1919_v47 = vld [vmem:[%s2932_s3 + $0xe0] ss:$8 sps:$4 sm:$0xff]   ;;  %v1920_v48 = vld [vmem:[%s2932_s3 + $0xf4] ss:$8 sps:$4 sm:$0xff]   ;;  %v1922_v49 = vld [vmem:[%s2932_s3 + $0xf0] ss:$8 sps:$4 sm:$0xff]  }
  0x2b   :  { %815 = vmatprep.subr.bf16.mxu1 %v1884_v24  ;;  %v2200_v51 = vshrl.u32 %v48_v50, 7  ;;  %v46_v53 = vld [vmem:[%s2931_s2] sm:$0x3] }
  0x2d   :  { %v50_v52 = vsub.s32 0, %v2200_v51  ;;  %v54_v54 = vsub.s32 1, %v2200_v51  ;;  %v1938_v51 = vld [vmem:[%s2934_s5 + $0x38] sm:$0xff]  }
  0x2e   :  { %816 = vmatpush1.bf16.msra.mxu1 %v1886_v25 }
  0x2f   :  { %817 = vmatprep.subr.bf16.mxu1 %v1887_v26  ;;  %v51_v55 = vrot.slane %v46_v53, %v50_v52  ;;  %v55_v56 = vrot.slane %v46_v53, %v54_v54 }
  0x32   :  { %818 = vmatpush1.bf16.msra.mxu1 %v1889_v27 }
  0x33   :  { %819 = vmatprep.subr.bf16.mxu1 %v1890_v28  ;;  %v2004_v28 = vmov 683565275  }
  0x36   :  { %820 = vmatpush1.bf16.msra.mxu1 %v1892_v29 }
  0x37   :  { %821 = vmatprep.subr.bf16.mxu1 %v1893_v30  ;;  %v2005_v30 = vmov 2475754826  }
  0x3a   :  { %822 = vmatpush1.bf16.msra.mxu1 %v1895_v31 }
  0x3b   :  { %823 = vmatprep.subr.bf16.mxu1 %v1896_v32  ;;  %v2006_v32 = vmov 2131351028  }
  0x3e   :  { %824 = vmatpush1.bf16.msra.mxu1 %v1898_v33 }
  0x3f   :  { %825 = vmatprep.subr.bf16.mxu1 %v1899_v34 }
  0x42   :  { %826 = vmatpush1.bf16.msra.mxu1 %v1901_v35 }
  0x43   :  { %827 = vmatprep.subr.bf16.mxu1 %v1902_v36 }
  0x46   :  { %828 = vmatpush1.bf16.msra.mxu1 %v1904_v37  ;;  %v2007_v37 = vmov 2102212464  }
  0x47   :  { %829 = vmatprep.subr.bf16.mxu1 %v1905_v38 }
  0x4a   :  { %830 = vmatpush1.bf16.msra.mxu1 %v1907_v39 }
  0x4b   :  { %831 = vmatprep.subr.bf16.mxu1 %v1908_v40  ;;  %v2008_v40 = vmov 920167782  }
  0x4e   :  { %832 = vmatpush1.bf16.msra.mxu1 %v1910_v41 }
  0x4f   :  { %833 = vmatprep.subr.bf16.mxu1 %v1911_v42 }
  0x52   :  { %834 = vmatpush1.bf16.msra.mxu1 %v1913_v43  ;;  %v2009_v43 = vmov 1326507024  }
  0x53   :  { %835 = vmatprep.subr.bf16.mxu1 %v1914_v44 }
  0x56   :  { %836 = vmatpush1.bf16.msra.mxu1 %v1916_v45 }
  0x57   :  { %837 = vmatprep.subr.bf16.mxu1 %v1917_v46 }
  0x5a   :  { %838 = vmatpush1.bf16.msra.mxu1 %v1919_v47 }
  0x5b   :  { %839 = vmatprep.subr.bf16.mxu1 %v1920_v48 }
  0x5e   :  { %840 = vmatpush1.bf16.msra.mxu1 %v1922_v49 }
  0xf5   :  { %v178_v57 = vpop.f32.mrb[0].mxu0 }
  0xf6   :  { %v2211_v58 = vadd.f32 %v178_v57, %v51_v55  ;;  %v180_v59 = vpop.f32.mrb[1].mxu0 }
  0xf7   :  { %v2213_v60 = vadd.f32 %v180_v59, %v55_v56  ;;  %v182_v61 = vpop.f32.mrb[2].mxu0 }
  0xf8   :  { %v187_v62 = vand.u32 2147483647, %v2211_v58  ;;  %v190_v63 = vand.u32 2139095040, %v2211_v58  ;;  %v2217_v0 = vadd.f32 %v182_v61, %v51_v55  ;;  %v184_v1 = vpop.f32.mrb[3].mxu0 }
  0xf9   :  { %v294_v2 = vand.u32 2139095040, %v2213_v60  ;;  %v2220_v3 = vadd.f32 %v184_v1, %v55_v56 }
  0xfa   :  { %v191_v4 = vshrl.u32 %v190_v63, 23  ;;  %v194_v5 = vand.u32 8388607, %v187_v62  ;;  %v398_v7 = vand.u32 2139095040, %v2217_v0  ;;  %v395_v9 = vand.u32 2147483647, %v2217_v0 }
  0xfb   :  { %v295_v6 = vshrl.u32 %v294_v2, 23  ;;  %v502_v10 = vand.u32 2139095040, %v2220_v3 }
  0xfc   :  { %v1689_v8 = vadd.s32 4294967169, %v191_v4  ;;  %v399_v12 = vshrl.u32 %v398_v7, 23  ;;  %v195_v14 = vor.u32 8388608, %v194_v5  ;;  %v402_v17 = vand.u32 8388607, %v395_v9 }
  0xfd   :  { %v1693_v11 = vadd.s32 4294967169, %v295_v6  ;;  %v503_v18 = vshrl.u32 %v502_v10, 23 }
  0xfe   :  { %v197_v13 = vadd.s32 1, %v1689_v8  ;;  %v1697_v16 = vadd.s32 4294967169, %v399_v12  ;;  %v2231_v23 = vshll.u32 %v195_v14, 8  ;;  %v403_v25 = vor.u32 8388608, %v402_v17 }
  0xff   :  { %v301_v15 = vadd.s32 1, %v1693_v11  ;;  %v1701_v27 = vadd.s32 4294967169, %v503_v18  ;;  %v291_v17 = vand.u32 2147483647, %v2213_v60 }
 0x100   :  { %vm198_vm0 = vcmp.gt.s32.totalorder %v197_v13, 0  ;;  %v405_v26 = vadd.s32 1, %v1697_v16  ;;  %v2261_v16 = vshll.u32 %v403_v25, 8 }
 0x101   :  { %v199_v19 = vsel %vm198_vm0, %v197_v13, 0  ;;  %vm302_vm1 = vcmp.gt.s32.totalorder %v301_v15, 0  ;;  %v2247_v1 = vadd.s32 1, %v1701_v27 }
 0x102   :  { %v201_v20 = vand.u32 31, %v199_v19  ;;  %v2229_v21 = vsel %vm302_vm1, %v301_v15, 0  ;;  %v200_v22 = vshrl.u32 %v199_v19, 5  ;;  %vm406_vm6 = vcmp.gt.s32.totalorder %v405_v26, 0 }
 0x103   :  { %v2237_v34 = vand.u32 31, %v2229_v21  ;;  %v407_v14 = vsel %vm406_vm6, %v405_v26, 0  ;;  %vm510_vm8 = vcmp.gt.s32.totalorder %v2247_v1, 0 }
 0x104   :  { %v202_v24 = vsub.s32 32, %v201_v20  ;;  %v204_v29 = vshll.u32 %v2004_v28, %v201_v20  ;;  %v207_v31 = vshll.u32 %v2005_v30, %v201_v20  ;;  %v210_v33 = vshll.u32 %v2006_v32, %v201_v20 }
 0x105   :  { %v213_v39 = vshll.u32 %v2007_v37, %v201_v20  ;;  %v216_v42 = vshll.u32 %v2008_v40, %v201_v20  ;;  %vm219_vm2 = vcmp.lt.s32.totalorder %v200_v22, 1  ;;  %vm221_vm3 = vcmp.lt.s32.totalorder %v200_v22, 3 }
 0x106   :  { %v205_v35 = vshrl.u32 %v2005_v30, %v202_v24  ;;  %v208_v36 = vshrl.u32 %v2006_v32, %v202_v24  ;;  %v211_v38 = vshrl.u32 %v2007_v37, %v202_v24  ;;  %v214_v41 = vshrl.u32 %v2008_v40, %v202_v24 }
 0x107   :  { %v217_v44 = vshrl.u32 %v2009_v43, %v202_v24  ;;  %v203_v45 = vshrl.u32 %v2004_v28, %v202_v24  ;;  %vm222_vm4 = vcmp.lt.s32.totalorder %v200_v22, 4  ;;  %vm220_vm5 = vcmp.lt.s32.totalorder %v200_v22, 2 }
 0x108   :  { %v206_v46 = vor.u32 %v205_v35, %v204_v29  ;;  %v209_v47 = vor.u32 %v208_v36, %v207_v31  ;;  %v212_v48 = vor.u32 %v211_v38, %v210_v33  ;;  %v215_v49 = vor.u32 %v214_v41, %v213_v39 }
 0x109   :  { %v218_v50 = vor.u32 %v217_v44, %v216_v42  ;;  %v2250_v8 = vsub.s32 32, %v2237_v34  ;;  %v409_v15 = vand.u32 31, %v407_v14  ;;  %v317_v19 = vshll.u32 %v2007_v37, %v2237_v34 }
 0x10a   :  { %v223_v53 = vsel %vm219_vm2, %v203_v45, %v206_v46  ;;  %v224_v55 = vsel %vm222_vm4, %v212_v48, 2102212464  ;;  %v227_v56 = vsel %vm219_vm2, %v206_v46, %v209_v47  ;;  %v231_v57 = vsel %vm219_vm2, %v209_v47, %v212_v48 }
 0x10b   :  { %v225_v59 = vsel %vm221_vm3, %v209_v47, %v224_v55  ;;  %v228_v61 = vsel %vm222_vm4, %v215_v49, 920167782  ;;  %v232_v63 = vsel %vm222_vm4, %v218_v50, 1326507024  ;;  %v318_v20 = vshrl.u32 %v2008_v40, %v2250_v8 }
 0x10c   :  { %v229_v2 = vsel %vm221_vm3, %v212_v48, %v228_v61  ;;  %v233_v4 = vsel %vm221_vm3, %v215_v49, %v232_v63  ;;  %v226_v5 = vsel %vm220_vm5, %v223_v53, %v225_v59  ;;  %v2271_v22 = vshrl.u32 %v2009_v43, %v2250_v8 }
 0x10d   :  { %v230_v6 = vsel %vm220_vm5, %v227_v56, %v229_v2  ;;  %v234_v7 = vsel %vm220_vm5, %v231_v57, %v233_v4  ;;  %v242_v18 = vmul.u32 %v2231_v23, %v226_v5  ;;  %v410_v25 = vsub.s32 32, %v409_v15 }
 0x10e   :  { %v2253_v10 = vmul.u32.u64.low %v2231_v23, %v234_v7  ;;  %v2254_v11 = vmul.u32.u64.high %v2231_v23, %v234_v7, %v2253_v10  ;;  %v2257_v12 = vmul.u32.u64.low %v2231_v23, %v230_v6  ;;  %v2258_v13 = vmul.u32.u64.high %v2231_v23, %v230_v6, %v2257_v12 }
 0x10f   :  { %v408_v26 = vshrl.u32 %v407_v14, 5  ;;  %v412_v23 = vshll.u32 %v2004_v28, %v409_v15  ;;  %v415_v27 = vshll.u32 %v2005_v30, %v409_v15  ;;  %v418_v29 = vshll.u32 %v2006_v32, %v409_v15 }
 0x110   :  { %vm244_vm7 = vc.u32 %v2254_v11, %v2257_v12  ;;  %v245_v24 = vadd.s32 1, %v2258_v13  ;;  %v413_v33 = vshrl.u32 %v2005_v30, %v410_v25  ;;  %v416_v35 = vshrl.u32 %v2006_v32, %v410_v25 }
 0x111   :  { %v421_v36 = vshll.u32 %v2007_v37, %v409_v15  ;;  %v411_v39 = vshrl.u32 %v2004_v28, %v410_v25  ;;  %v419_v41 = vshrl.u32 %v2007_v37, %v410_v25  ;;  %v422_v42 = vshrl.u32 %v2008_v40, %v410_v25 }
 0x112   :  { %v246_v31 = vsel %vm244_vm7, %v245_v24, %v2258_v13  ;;  %v414_v44 = vor.u32 %v413_v33, %v412_v23  ;;  %v417_v45 = vor.u32 %v416_v35, %v415_v27  ;;  %v424_v46 = vshll.u32 %v2008_v40, %v409_v15 }
 0x113   :  { %v247_v38 = vadd.s32 %v246_v31, %v242_v18  ;;  %v425_v47 = vshrl.u32 %v2009_v43, %v410_v25  ;;  %v420_v49 = vor.u32 %v419_v41, %v418_v29  ;;  %v423_v50 = vor.u32 %v422_v42, %v421_v36 }
 0x114   :  { %vm427_vm9 = vcmp.lt.s32.totalorder %v408_v26, 1  ;;  %vm428_vm10 = vcmp.lt.s32.totalorder %v408_v26, 2  ;;  %vm429_vm11 = vcmp.lt.s32.totalorder %v408_v26, 3  ;;  %vm430_vm12 = vcmp.lt.s32.totalorder %v408_v26, 4 }
 0x115   :  { %v248_v48 = vadd.s32 536870912, %v247_v38  ;;  %v426_v53 = vor.u32 %v425_v47, %v424_v46  ;;  %v432_v56 = vsel %vm430_vm12, %v420_v49, 2102212464  ;;  %v435_v57 = vsel %vm427_vm9, %v414_v44, %v417_v45 }
 0x116   :  { %v436_v59 = vsel %vm430_vm12, %v423_v50, 920167782  ;;  %v431_v61 = vsel %vm427_vm9, %v411_v39, %v414_v44  ;;  %v439_v2 = vsel %vm427_vm9, %v417_v45, %v420_v49  ;;  %v433_v6 = vsel %vm429_vm11, %v417_v45, %v432_v56 }
 0x117   :  { %v2289_v55 = vshrl.u32 %v248_v48, 30  ;;  %v437_v63 = vsel %vm429_vm11, %v420_v49, %v436_v59  ;;  %v440_v4 = vsel %vm430_vm12, %v426_v53, 1326507024  ;;  %v511_v18 = vsel %vm510_vm8, %v2247_v1, 0 }
 0x118   :  { %v438_v7 = vsel %vm428_vm10, %v435_v57, %v437_v63  ;;  %v441_v10 = vsel %vm429_vm11, %v423_v50, %v440_v4  ;;  %v320_v25 = vshll.u32 %v2008_v40, %v2237_v34  ;;  %v304_v29 = vshrl.u32 %v2229_v21, 5 }
 0x119   :  { %v250_v5 = vshll.u32 %v2289_v55, 30  ;;  %v442_v13 = vsel %vm428_vm10, %v439_v2, %v441_v10  ;;  %v2295_v14 = vmul.u32.u64.low %v2261_v16, %v438_v7  ;;  %v2296_v15 = vmul.u32.u64.high %v2261_v16, %v438_v7, %v2295_v14 }
 0x11a   :  { %v2307_v23 = vmul.u32.u64.low %v2261_v16, %v442_v13  ;;  %v2308_v27 = vmul.u32.u64.high %v2261_v16, %v442_v13, %v2307_v23  ;;  %v434_v31 = vsel %vm428_vm10, %v431_v61, %v433_v6  ;;  %v298_v33 = vand.u32 8388607, %v291_v17 }
 0x11b   :  { %v2302_v24 = vsub.s32 %v247_v38, %v250_v5  ;;  %v319_v35 = vor.u32 %v318_v20, %v317_v19  ;;  %v322_v36 = vor.u32 %v2271_v22, %v320_v25  ;;  %v2315_v1 = vand.u32 31, %v511_v18 }
 0x11c   :  { %v309_v38 = vshrl.u32 %v2005_v30, %v2250_v8  ;;  %v453_v39 = vadd.s32 1, %v2296_v15  ;;  %v308_v41 = vshll.u32 %v2004_v28, %v2237_v34  ;;  %v311_v21 = vshll.u32 %v2005_v30, %v2237_v34 }
 0x11d   :  { %v312_v26 = vshrl.u32 %v2006_v32, %v2250_v8  ;;  %v253_v19 = vsub.s32 0, %v2302_v24  ;;  %v450_v20 = vmul.u32 %v2261_v16, %v434_v31  ;;  %vm452_vm13 = vc.u32 %v2308_v27, %v2295_v14 }
 0x11e   :  { %v454_v22 = vsel %vm452_vm13, %v453_v39, %v2296_v15  ;;  %v310_v42 = vor.u32 %v309_v38, %v308_v41  ;;  %vm326_vm14 = vcmp.lt.s32.totalorder %v304_v29, 4  ;;  %v314_v46 = vshll.u32 %v2006_v32, %v2237_v34 }
 0x11f   :  { %v313_v44 = vor.u32 %v312_v26, %v311_v21  ;;  %v455_v45 = vadd.s32 %v454_v22, %v450_v20  ;;  %v315_v47 = vshrl.u32 %v2007_v37, %v2250_v8  ;;  %v332_v48 = vsel %vm326_vm14, %v319_v35, 920167782 }
 0x120   :  { %v336_v49 = vsel %vm326_vm14, %v322_v36, 1326507024  ;;  %v2338_v16 = vsub.s32 32, %v2315_v1  ;;  %v299_v50 = vor.u32 8388608, %v298_v33  ;;  %v1690_v53 = vmin.u32 %v253_v19, %v2302_v24 }
 0x121   :  { %v456_v56 = vadd.s32 536870912, %v455_v45  ;;  %v316_v57 = vor.u32 %v315_v47, %v314_v46  ;;  %vm323_vm15 = vcmp.lt.s32.totalorder %v304_v29, 1  ;;  %v307_v59 = vshrl.u32 %v2004_v28, %v2250_v8 }
 0x122   :  { %vm324_vm0 = vcmp.lt.s32.totalorder %v304_v29, 2  ;;  %vm325_vm1 = vcmp.lt.s32.totalorder %v304_v29, 3  ;;  %v331_v34 = vsel %vm323_vm15, %v310_v42, %v313_v44  ;;  %v526_v5 = vshrl.u32 %v2008_v40, %v2338_v16 }
 0x123   :  { %v2344_v61 = vshrl.u32 %v456_v56, 30  ;;  %v328_v63 = vsel %vm326_vm14, %v316_v57, 2102212464  ;;  %v333_v2 = vsel %vm325_vm1, %v316_v57, %v332_v48  ;;  %v337_v4 = vsel %vm325_vm1, %v319_v35, %v336_v49 }
 0x124   :  { %v334_v6 = vsel %vm324_vm0, %v331_v34, %v333_v2  ;;  %v335_v7 = vsel %vm323_vm15, %v313_v44, %v316_v57  ;;  %v339_v10 = vshll.u32 %v299_v50, 8  ;;  %v255_v13 = vclz %v1690_v53 }
 0x125   :  { %v458_v8 = vshll.u32 %v2344_v61, 30  ;;  %v529_v15 = vshrl.u32 %v2009_v43, %v2338_v16  ;;  %v327_v25 = vsel %vm323_vm15, %v307_v59, %v310_v42  ;;  %v329_v23 = vsel %vm325_vm1, %v313_v44, %v328_v63 }
 0x126   :  { %v338_v31 = vsel %vm324_vm0, %v335_v7, %v337_v4  ;;  %v2356_v33 = vmul.u32.u64.low %v339_v10, %v334_v6  ;;  %v2357_v35 = vmul.u32.u64.high %v339_v10, %v334_v6, %v2356_v33  ;;  %v499_v38 = vand.u32 2147483647, %v2220_v3 }
 0x127   :  { %v2360_v36 = vsub.s32 %v455_v45, %v458_v8  ;;  %v525_v39 = vshll.u32 %v2007_v37, %v2315_v1  ;;  %v528_v41 = vshll.u32 %v2008_v40, %v2315_v1  ;;  %v512_v20 = vshrl.u32 %v511_v18, 5 }
 0x128   :  { %v2367_v21 = vmul.u32.u64.low %v339_v10, %v338_v31  ;;  %v2368_v26 = vmul.u32.u64.high %v339_v10, %v338_v31, %v2367_v21  ;;  %v330_v22 = vsel %vm324_vm0, %v327_v25, %v329_v23  ;;  %v1691_v42 = vadd.s32 4294967294, %v255_v13 }
 0x129   :  { %v461_v19 = vsub.s32 0, %v2360_v36  ;;  %v527_v44 = vor.u32 %v526_v5, %v525_v39  ;;  %v530_v45 = vor.u32 %v529_v15, %v528_v41  ;;  %v349_v46 = vadd.s32 1, %v2357_v35 }
 0x12a   :  { %v506_v48 = vand.u32 8388607, %v499_v38  ;;  %v517_v49 = vshrl.u32 %v2005_v30, %v2338_v16  ;;  %v520_v50 = vshrl.u32 %v2006_v32, %v2338_v16  ;;  %v346_v53 = vmul.u32 %v339_v10, %v330_v22 }
 0x12b   :  { %v1698_v47 = vmin.u32 %v461_v19, %v2360_v36  ;;  %vm348_vm2 = vc.u32 %v2368_v26, %v2356_v33  ;;  %v516_v18 = vshll.u32 %v2004_v28, %v2315_v1  ;;  %v519_v29 = vshll.u32 %v2005_v30, %v2315_v1 }
 0x12c   :  { %v350_v57 = vsel %vm348_vm2, %v349_v46, %v2357_v35  ;;  %v522_v59 = vshll.u32 %v2006_v32, %v2315_v1  ;;  %v523_v34 = vshrl.u32 %v2007_v37, %v2338_v16  ;;  %vm534_vm3 = vcmp.lt.s32.totalorder %v512_v20, 4 }
 0x12d   :  { %v463_v56 = vclz %v1698_v47  ;;  %v351_v63 = vadd.s32 %v350_v57, %v346_v53  ;;  %v518_v4 = vor.u32 %v517_v49, %v516_v18  ;;  %v521_v5 = vor.u32 %v520_v50, %v519_v29 }
 0x12e   :  { %v524_v6 = vor.u32 %v523_v34, %v522_v59  ;;  %v540_v7 = vsel %vm534_vm3, %v527_v44, 920167782  ;;  %v544_v10 = vsel %vm534_vm3, %v530_v45, 1326507024  ;;  %vm1692_vm4 = vcmp.lt.s32.totalorder %v1691_v42, 0 }
 0x12f   :  { %v1699_v2 = vadd.s32 4294967294, %v463_v56  ;;  %v352_v13 = vadd.s32 536870912, %v351_v63  ;;  %v507_v8 = vor.u32 8388608, %v506_v48  ;;  %vm531_vm5 = vcmp.lt.s32.totalorder %v512_v20, 1 }
 0x130   :  { %vm533_vm6 = vcmp.lt.s32.totalorder %v512_v20, 3  ;;  %v539_v1 = vsel %vm531_vm5, %v518_v4, %v521_v5  ;;  %v258_v31 = vsel %vm1692_vm4, 0, %v1691_v42  ;;  %v515_v39 = vshrl.u32 %v2004_v28, %v2338_v16 }
 0x131   :  { %v2393_v15 = vshrl.u32 %v352_v13, 30  ;;  %vm1700_vm7 = vcmp.lt.s32.totalorder %v1699_v2, 0  ;;  %v541_v25 = vsel %vm533_vm6, %v524_v6, %v540_v7  ;;  %v545_v23 = vsel %vm533_vm6, %v527_v44, %v544_v10 }
 0x132   :  { %vm532_vm8 = vcmp.lt.s32.totalorder %v512_v20, 2  ;;  %v536_v41 = vsel %vm534_vm3, %v524_v6, 2102212464  ;;  %v543_v21 = vsel %vm531_vm5, %v521_v5, %v524_v6  ;;  %v547_v19 = vshll.u32 %v507_v8, 8 }
 0x133   :  { %v354_v35 = vshll.u32 %v2393_v15, 30  ;;  %v466_v22 = vsel %vm1700_vm7, 0, %v1699_v2  ;;  %v542_v46 = vsel %vm532_vm8, %v539_v1, %v541_v25  ;;  %v546_v47 = vsel %vm532_vm8, %v543_v21, %v545_v23 }
 0x134   :  { %v263_v48 = vsub.s32 4294967266, %v258_v31  ;;  %v535_v42 = vsel %vm531_vm5, %v515_v39, %v518_v4  ;;  %v537_v49 = vsel %vm533_vm6, %v521_v5, %v536_v41  ;;  %v471_v53 = vsub.s32 4294967266, %v466_v22 }
 0x135   :  { %v355_v45 = vsub.s32 %v351_v63, %v354_v35  ;;  %v2407_v50 = vmul.u32.u64.low %v547_v19, %v546_v47  ;;  %v2408_v16 = vmul.u32.u64.high %v547_v19, %v546_v47, %v2407_v50  ;;  %v538_v59 = vsel %vm532_vm8, %v535_v42, %v537_v49 }
 0x136   :  { %v2410_v18 = vmul.u32.u64.low %v547_v19, %v542_v46  ;;  %v2411_v29 = vmul.u32.u64.high %v547_v19, %v542_v46, %v2410_v18  ;;  %v264_v57 = vadd.s32 127, %v263_v48  ;;  %v259_v34 = vsub.s32 32, %v258_v31 }
 0x137   :  { %v357_v44 = vsub.s32 0, %v355_v45  ;;  %v472_v2 = vadd.s32 127, %v471_v53  ;;  %v243_v5 = vadd.s32 %v2257_v12, %v2254_v11  ;;  %v554_v7 = vmul.u32 %v547_v19, %v538_v59 }
 0x138   :  { %vm556_vm9 = vc.u32 %v2408_v16, %v2410_v18  ;;  %v557_v4 = vadd.s32 1, %v2411_v29  ;;  %v265_v10 = vshll.u32 %v264_v57, 23  ;;  %v467_v13 = vsub.s32 32, %v466_v22 }
 0x139   :  { %v1694_v56 = vmin.u32 %v357_v44, %v355_v45  ;;  %v261_v1 = vshrl.u32 %v243_v5, %v259_v34  ;;  %v451_v25 = vadd.s32 %v2295_v14, %v2308_v27  ;;  %v473_v23 = vshll.u32 %v472_v2, 23 }
 0x13a   :  { %v558_v8 = vsel %vm556_vm9, %v557_v4, %v2411_v29  ;;  %v260_v39 = vshll.u32 %v2302_v24, %v258_v31  ;;  %v266_v46 = vor.u32 4788187, %v265_v10  ;;  %v347_v12 = vadd.s32 %v2356_v33, %v2368_v26 }
 0x13b   :  { %v359_v63 = vclz %v1694_v56  ;;  %v559_v20 = vadd.s32 %v558_v8, %v554_v7  ;;  %v469_v11 = vshrl.u32 %v451_v25, %v467_v13  ;;  %v468_v42 = vshll.u32 %v2360_v36, %v466_v22 }
 0x13c   :  { %v262_v47 = vor.u32 %v261_v1, %v260_v39  ;;  %v474_v44 = vor.u32 4788187, %v473_v23  ;;  %v267_v27 = vand.u32 2147483647, %v266_v46  ;;  %vm189_vm11 = vcmp.lt.s32.totalorder %v2211_v58, 0 }
 0x13d   :  { %v1695_v6 = vadd.s32 4294967294, %v359_v63  ;;  %v560_v19 = vadd.s32 536870912, %v559_v20  ;;  %v470_v53 = vor.u32 %v469_v11, %v468_v42  ;;  %vm2435_vm13 = vcmp.le.f32.partialorder %v187_v62, 0.7853982 }
 0x13e   :  { %v269_v56 = vcvt.s32.f32 %v262_v47  ;;  %v475_v57 = vand.u32 2147483647, %v474_v44  ;;  %vm397_vm14 = vcmp.lt.s32.totalorder %v2217_v0, 0  ;;  %v555_v23 = vadd.s32 %v2410_v18, %v2408_v16 }
 0x13f   :  { %vm1696_vm10 = vcmp.lt.s32.totalorder %v1695_v6, 0  ;;  %v2427_v50 = vshrl.u32 %v560_v19, 30  ;;  %v477_v34 = vcvt.s32.f32 %v470_v53  ;;  %vm2449_vm15 = vcmp.le.f32.partialorder %v395_v9, 0.7853982 }
 0x140   :  { %v362_v35 = vsel %vm1696_vm10, 0, %v1695_v6  ;;  %v270_v26 = vmul.f32 %v269_v56, %v267_v27  ;;  %vm293_vm0 = vcmp.lt.s32.totalorder %v2213_v60, 0  ;;  %vm2461_vm1 = vcmp.le.f32.partialorder %v291_v17, 0.7853982 }
 0x141   :  { %v363_v41 = vsub.s32 32, %v362_v35  ;;  %v367_v21 = vsub.s32 4294967266, %v362_v35  ;;  %v364_v24 = vshll.u32 %v355_v45, %v362_v35  ;;  %v562_v31 = vshll.u32 %v2427_v50, 30 }
 0x142   :  { %v478_v36 = vmul.f32 %v477_v34, %v475_v57  ;;  %v271_v5 = vxor.u32 2147483648, %v270_v26  ;;  %v481_v42 = vsub.s32 4, %v2344_v61  ;;  %v377_v44 = vsub.s32 4, %v2393_v15 }
 0x143   :  { %v368_v48 = vadd.s32 127, %v367_v21  ;;  %v365_v49 = vshrl.u32 %v347_v12, %v363_v41  ;;  %v563_v33 = vsub.s32 %v559_v20, %v562_v31  ;;  %v585_v53 = vsub.s32 4, %v2427_v50 }
 0x144   :  { %v479_v10 = vxor.u32 2147483648, %v478_v36  ;;  %v272_v45 = vsel %vm189_vm11, %v271_v5, %v270_v26  ;;  %v378_v31 = vsel %vm293_vm0, %v377_v44, %v2393_v15  ;;  %vm501_vm2 = vcmp.lt.s32.totalorder %v2220_v3, 0 }
 0x145   :  { %v369_v14 = vshll.u32 %v368_v48, 23  ;;  %v366_v59 = vor.u32 %v365_v49, %v364_v24  ;;  %v565_v2 = vsub.s32 0, %v563_v33  ;;  %v275_v41 = vsel %vm2435_vm13, %v2211_v58, %v272_v45 }
 0x146   :  { %v480_v25 = vsel %vm397_vm14, %v479_v10, %v478_v36  ;;  %1939 = vcosq.f32 %v275_v41  ;;  %v482_v24 = vsel %vm397_vm14, %v481_v42, %v2344_v61  ;;  %vm2488_vm3 = vcmp.le.f32.partialorder %v499_v38, 0.7853982  ;;  %v1930_v61 = vld [vmem:[%s2934_s5 + $0x18] sm:$0xff]  }
 0x147   :  { %v370_v29 = vor.u32 4788187, %v369_v14  ;;  %v373_v22 = vcvt.s32.f32 %v366_v59  ;;  %v1702_v4 = vmin.u32 %v565_v2, %v563_v33  ;;  %v483_v18 = vsel %vm2449_vm15, %v2217_v0, %v480_v25 }
 0x148   :  { %1941 = vcosq.f32 %v483_v18  ;;  %v273_v14 = vsub.s32 4, %v2289_v55  ;;  %v484_v57 = vsel %vm2449_vm15, 0, %v482_v24  ;;  %v380_v59 = vsel %vm2461_vm1, 0, %v378_v31 }
 0x149   :  { %v371_v63 = vand.u32 2147483647, %v370_v29  ;;  %v567_v7 = vclz %v1702_v4  ;;  %1943 = vsinq.f32 %v483_v18  ;;  %v488_v2 = vadd.s32 3, %v484_v57  ;;  %v1928_v57 = vld [vmem:[%s2934_s5 + $0x10] sm:$0xff]  }
 0x14a   :  { %v274_v56 = vsel %vm189_vm11, %v273_v14, %v2289_v55 }
 0x14b   :  { %v374_v6 = vmul.f32 %v373_v22, %v371_v63  ;;  %v1703_v13 = vadd.s32 4294967294, %v567_v7  ;;  %v276_v34 = vsel %vm2435_vm13, 0, %v274_v56  ;;  %v384_v22 = vadd.s32 3, %v380_v59  ;;  %v1923_v56 = vld [vmem:[%s2934_s5 + $0x40] sm:$0xff]   ;;  %v1929_v59 = vld [vmem:[%s2934_s5 + $0x58] sm:$0xff]  }
 0x14c   :  { %v280_v5 = vadd.s32 3, %v276_v34  ;;  %v489_v10 = vand.u32 3, %v488_v2  ;;  %1778 = vmatprep.subr.bf16.mxu0 %v1923_v56  ;;  %v1934_v34 = vld [vmem:[%s2934_s5 + $0x28] sm:$0xff]  }
 0x14d   :  { %v375_v8 = vxor.u32 2147483648, %v374_v6  ;;  %vm1704_vm12 = vcmp.lt.s32.totalorder %v1703_v13, 0 }
 0x14e   :  { %v570_v20 = vsel %vm1704_vm12, 0, %v1703_v13  ;;  %v385_v13 = vand.u32 3, %v384_v22  ;;  %v281_v25 = vand.u32 3, %v280_v5  ;;  %vm491_vm4 = vcmp.eq.s32.totalorder %v489_v10, 0  ;;  %v1936_v22 = vld [vmem:[%s2934_s5 + $0x30] sm:$0xff]  }
 0x14f   :  { %v571_v35 = vsub.s32 32, %v570_v20  ;;  %v575_v39 = vsub.s32 4294967266, %v570_v20  ;;  %v376_v21 = vsel %vm293_vm0, %v375_v8, %v374_v6  ;;  %v572_v46 = vshll.u32 %v563_v33, %v570_v20 }
 0x150   :  { %v379_v47 = vsel %vm2461_vm1, %v2213_v60, %v376_v21  ;;  %v586_v33 = vsel %vm501_vm2, %v585_v53, %v2427_v50  ;;  %v1940_v26 = vpop.eup %1939  ;;  %vm494_vm5 = vcmp.eq.s32.totalorder %v489_v10, 2  ;;  %vm387_vm6 = vcmp.eq.s32.totalorder %v385_v13, 0 }
 0x151   :  { %v573_v11 = vshrl.u32 %v555_v23, %v571_v35  ;;  %v576_v16 = vadd.s32 127, %v575_v39  ;;  %1945 = vcosq.f32 %v379_v47  ;;  %v588_v38 = vsel %vm2488_vm3, 0, %v586_v33  ;;  %v1932_v33 = vld [vmem:[%s2934_s5 + $0x20] sm:$0xff]  }
 0x152   :  { %1947 = vsinq.f32 %v379_v47  ;;  %v1942_v63 = vpop.eup %1941  ;;  %v592_v7 = vadd.s32 3, %v588_v38  ;;  %v287_v35 = vxor.u32 2147483648, %v1940_v26  ;;  %vm390_vm7 = vcmp.eq.s32.totalorder %v385_v13, 2  ;;  %v1937_v38 = vld [vmem:[%s2934_s5 + $0x78] sm:$0xff]  }
 0x153   :  { %v574_v9 = vor.u32 %v573_v11, %v572_v46  ;;  %v577_v19 = vshll.u32 %v576_v16, 23  ;;  %1949 = vsinq.f32 %v275_v41  ;;  %v1944_v36 = vpop.eup %1943  ;;  %v495_v8 = vxor.u32 2147483648, %v1942_v63 }
 0x154   :  { %v492_v45 = vxor.u32 2147483648, %v1944_v36  ;;  %v593_v39 = vand.u32 3, %v592_v7  ;;  %vm283_vm8 = vcmp.eq.s32.totalorder %v281_v25, 0  ;;  %vm286_vm9 = vcmp.eq.s32.totalorder %v281_v25, 2 }
 0x155   :  { %v578_v48 = vor.u32 4788187, %v577_v19  ;;  %v581_v17 = vcvt.s32.f32 %v574_v9  ;;  %v496_v62 = vsel %vm494_vm5, %v495_v8, %v1944_v36  ;;  %vm490_vm10 = vcmp.lt.s32.totalorder %v489_v10, 2 }
 0x156   :  { %v493_v41 = vsel %vm491_vm4, %v1942_v63, %v492_v45  ;;  %vm386_vm11 = vcmp.lt.s32.totalorder %v385_v13, 2  ;;  %vm598_vm12 = vcmp.eq.s32.totalorder %v593_v39, 2  ;;  %vm595_vm13 = vcmp.eq.s32.totalorder %v593_v39, 0  ;;  %v1935_v63 = vld [vmem:[%s2934_s5 + $0x70] sm:$0xff]  }
 0x157   :  { %v579_v49 = vand.u32 2147483647, %v578_v48  ;;  %v497_v47 = vsel %vm490_vm10, %v493_v41, %v496_v62  ;;  %vm282_vm14 = vcmp.lt.s32.totalorder %v281_v25, 2  ;;  %vm594_vm15 = vcmp.lt.s32.totalorder %v593_v39, 2 }
 0x158   :  { %vm487_vm0 = vweird.f32 %v2217_v0  ;;  %vm383_vm1 = vweird.f32 %v2213_v60  ;;  %v1924_v60 = vld [vmem:[%s2934_s5] sm:$0xff]   ;;  %v1925_v0 = vld [vmem:[%s2934_s5 + $0x48] sm:$0xff]  }
 0x159   :  { %v582_v27 = vmul.f32 %v581_v17, %v579_v49  ;;  %v498_v14 = vsel %vm487_vm0, nan, %v497_v47  ;;  %1779 = vmatpush3.bf16.msra.mxu0 %v1924_v60 }
 0x15a   :  { %1780 = vmatprep.subr.bf16.mxu0 %v1925_v0 }
 0x15b   :  { %v583_v29 = vxor.u32 2147483648, %v582_v27  ;;  %v1946_v4 = vpop.eup %1945 }
 0x15c   :  { %v1948_v50 = vpop.eup %1947  ;;  %v391_v20 = vxor.u32 2147483648, %v1946_v4 }
 0x15d   :  { %v584_v15 = vsel %vm501_vm2, %v583_v29, %v582_v27  ;;  %v1950_v6 = vpop.eup %1949  ;;  %v388_v1 = vxor.u32 2147483648, %v1948_v50  ;;  %vm591_vm2 = vweird.f32 %v2220_v3 }
 0x15e   :  { %v587_v55 = vsel %vm2488_vm3, %v2220_v3, %v584_v15  ;;  %v284_v23 = vxor.u32 2147483648, %v1950_v6  ;;  %v392_v11 = vsel %vm390_vm7, %v391_v20, %v1948_v50  ;;  %v288_v9 = vsel %vm286_vm9, %v287_v35, %v1950_v6  ;;  %v1927_v3 = vld [vmem:[%s2934_s5 + $0x50] sm:$0xff]   ;;  %v1931_v15 = vld [vmem:[%s2934_s5 + $0x60] sm:$0xff]  }
 0x15f   :  { %1951 = vcosq.f32 %v587_v55  ;;  %v389_v46 = vsel %vm387_vm6, %v1946_v4, %v388_v1  ;;  %vm279_vm3 = vweird.f32 %v2211_v58  ;;  %v1926_v58 = vld [vmem:[%s2934_s5 + $0x8] sm:$0xff]  }
 0x160   :  { %1953 = vsinq.f32 %v587_v55  ;;  %v285_v12 = vsel %vm283_vm8, %v1940_v26, %v284_v23  ;;  %v393_v48 = vsel %vm386_vm11, %v389_v46, %v392_v11  ;;  %1781 = vmatpush3.bf16.msra.mxu0 %v1926_v58  ;;  %v1933_v26 = vld [vmem:[%s2934_s5 + $0x68] sm:$0xff]   ;;  %v637_v55 = vld [vmem:[%s2933_s4] sm:$0x3] }
 0x161   :  { %v289_v49 = vsel %vm282_vm14, %v285_v12, %v288_v9  ;;  %v394_v27 = vsel %vm383_vm1, nan, %v393_v48  ;;  %1782 = vmatprep.subr.bf16.mxu0 %v1927_v3  ;;  %v642_v2 = vrot.slane %v637_v55, %v50_v52  ;;  %v646_v36 = vrot.slane %v637_v55, %v54_v54 }
 0x162   :  { %v290_v31 = vsel %vm279_vm3, nan, %v289_v49 }
 0x163   :  { %v603_v29 = vpack.c.bf16 %v498_v14, %v290_v31 }
 0x164   :  { %1783 = vmatpush3.bf16.msra.mxu0 %v1928_v57 }
 0x165   :  { %1784 = vmatprep.subr.bf16.mxu0 %v1929_v59 }
 0x168   :  { %1785 = vmatpush3.bf16.msra.mxu0 %v1930_v61 }
 0x169   :  { %v1952_v21 = vpop.eup %1951  ;;  %1786 = vmatprep.subr.bf16.mxu0 %v1931_v15 }
 0x16a   :  { %v1954_v16 = vpop.eup %1953  ;;  %v599_v18 = vxor.u32 2147483648, %v1952_v21 }
 0x16b   :  { %v596_v19 = vxor.u32 2147483648, %v1954_v16 }
 0x16c   :  { %v600_v42 = vsel %vm598_vm12, %v599_v18, %v1954_v16  ;;  %1787 = vmatpush3.bf16.msra.mxu0 %v1932_v33 }
 0x16d   :  { %v597_v44 = vsel %vm595_vm13, %v1952_v21, %v596_v19  ;;  %1788 = vmatprep.subr.bf16.mxu0 %v1933_v26 }
 0x16e   :  { %v601_v17 = vsel %vm594_vm15, %v597_v44, %v600_v42 }
 0x16f   :  { %v602_v53 = vsel %vm591_vm2, nan, %v601_v17 }
 0x170   :  { %v604_v24 = vpack.c.bf16 %v602_v53, %v394_v27  ;;  %1789 = vmatpush3.bf16.msra.mxu0 %v1934_v34 }
 0x171   :  { %1790 = vmatprep.subr.bf16.mxu0 %v1935_v63 }
 0x172   :  { %841 = vmatprep.mubr.bf16.mxu1 %v604_v24 }
 0x173   :  { %842 = vmatmul.mubr.bf16.vlgmr.msra.gmra.mrb[0].mxu1 %v603_v29 }
 0x174   :  { %1791 = vmatpush3.bf16.msra.mxu0 %v1936_v22 }
 0x175   :  { %1792 = vmatprep.subr.bf16.mxu0 %v1937_v38 }
 0x178   :  { %1793 = vmatpush3.bf16.msra.mxu0 %v1938_v51 }
 0x246   :  { %v843_v4 = vpop.f32.mrb[0].mxu1 }
 0x247   :  { %v2556_v5 = vadd.f32 %v843_v4, %v642_v2  ;;  %v845_v50 = vpop.f32.mrb[1].mxu1 }
 0x248   :  { %v2558_v6 = vadd.f32 %v845_v50, %v646_v36  ;;  %v847_v52 = vpop.f32.mrb[2].mxu1 }
 0x249   :  { %v852_v54 = vand.u32 2147483647, %v2556_v5  ;;  %v855_v7 = vand.u32 2139095040, %v2556_v5  ;;  %v2565_v10 = vadd.f32 %v847_v52, %v642_v2  ;;  %v849_v13 = vpop.f32.mrb[3].mxu1 }
 0x24a   :  { %v956_v45 = vand.u32 2147483647, %v2558_v6  ;;  %v959_v8 = vand.u32 2139095040, %v2558_v6  ;;  %v2574_v48 = vadd.f32 %v849_v13, %v646_v36 }
 0x24b   :  { %v856_v1 = vshrl.u32 %v855_v7, 23  ;;  %v859_v20 = vand.u32 8388607, %v852_v54  ;;  %v1063_v35 = vand.u32 2139095040, %v2565_v10  ;;  %v1060_v49 = vand.u32 2147483647, %v2565_v10 }
 0x24c   :  { %v960_v25 = vshrl.u32 %v959_v8, 23  ;;  %v963_v23 = vand.u32 8388607, %v956_v45 }
 0x24d   :  { %v1737_v39 = vadd.s32 4294967169, %v856_v1  ;;  %v1064_v62 = vshrl.u32 %v1063_v35, 23  ;;  %v860_v46 = vor.u32 8388608, %v859_v20 }
 0x24e   :  { %v1741_v41 = vadd.s32 4294967169, %v960_v25  ;;  %v964_v11 = vor.u32 8388608, %v963_v23 }
 0x24f   :  { %v862_v21 = vadd.s32 1, %v1737_v39  ;;  %v1745_v18 = vadd.s32 4294967169, %v1064_v62  ;;  %v2576_v42 = vshll.u32 %v860_v46, 8 }
 0x250   :  { %v966_v16 = vadd.s32 1, %v1741_v41  ;;  %v2578_v44 = vshll.u32 %v964_v11, 8 }
 0x251   :  { %vm863_vm4 = vcmp.gt.s32.totalorder %v862_v21, 0  ;;  %v2581_v17 = vadd.s32 1, %v1745_v18 }
 0x252   :  { %v864_v12 = vsel %vm863_vm4, %v862_v21, 0  ;;  %vm967_vm5 = vcmp.gt.s32.totalorder %v966_v16, 0 }
 0x253   :  { %v865_v9 = vshrl.u32 %v864_v12, 5  ;;  %v866_v19 = vand.u32 31, %v864_v12  ;;  %v968_v47 = vsel %vm967_vm5, %v966_v16, 0  ;;  %vm1071_vm10 = vcmp.gt.s32.totalorder %v2581_v17, 0 }
 0x254   :  { %v2584_v53 = vshrl.u32 %v968_v47, 5  ;;  %v970_v24 = vand.u32 31, %v968_v47 }
 0x255   :  { %v867_v14 = vsub.s32 32, %v866_v19  ;;  %v869_v27 = vshll.u32 %v2004_v28, %v866_v19  ;;  %v872_v31 = vshll.u32 %v2005_v30, %v866_v19  ;;  %v875_v29 = vshll.u32 %v2006_v32, %v866_v19 }
 0x256   :  { %v878_v56 = vshll.u32 %v2007_v37, %v866_v19  ;;  %v881_v60 = vshll.u32 %v2008_v40, %v866_v19  ;;  %vm884_vm6 = vcmp.lt.s32.totalorder %v865_v9, 1  ;;  %vm885_vm7 = vcmp.lt.s32.totalorder %v865_v9, 2 }
 0x257   :  { %v870_v0 = vshrl.u32 %v2005_v30, %v867_v14  ;;  %v873_v58 = vshrl.u32 %v2006_v32, %v867_v14  ;;  %v876_v3 = vshrl.u32 %v2007_v37, %v867_v14  ;;  %v868_v57 = vshrl.u32 %v2004_v28, %v867_v14 }
 0x258   :  { %v879_v59 = vshrl.u32 %v2008_v40, %v867_v14  ;;  %v882_v61 = vshrl.u32 %v2009_v43, %v867_v14  ;;  %v971_v55 = vsub.s32 32, %v970_v24  ;;  %vm886_vm8 = vcmp.lt.s32.totalorder %v865_v9, 3 }
 0x259   :  { %v871_v15 = vor.u32 %v870_v0, %v869_v27  ;;  %v874_v33 = vor.u32 %v873_v58, %v872_v31  ;;  %v877_v26 = vor.u32 %v876_v3, %v875_v29  ;;  %vm887_vm9 = vcmp.lt.s32.totalorder %v865_v9, 4 }
 0x25a   :  { %v880_v34 = vor.u32 %v879_v59, %v878_v56  ;;  %v883_v63 = vor.u32 %v882_v61, %v881_v60  ;;  %v973_v51 = vshll.u32 %v2004_v28, %v970_v24  ;;  %v974_v8 = vshrl.u32 %v2005_v30, %v971_v55 }
 0x25b   :  { %v888_v2 = vsel %vm884_vm6, %v868_v57, %v871_v15  ;;  %v889_v36 = vsel %vm887_vm9, %v877_v26, 2102212464  ;;  %v892_v22 = vsel %vm884_vm6, %v871_v15, %v874_v33  ;;  %v896_v38 = vsel %vm884_vm6, %v874_v33, %v877_v26 }
 0x25c   :  { %v890_v4 = vsel %vm886_vm8, %v874_v33, %v889_v36  ;;  %v893_v50 = vsel %vm887_vm9, %v880_v34, 920167782  ;;  %v897_v52 = vsel %vm887_vm9, %v883_v63, 1326507024  ;;  %v976_v1 = vshll.u32 %v2005_v30, %v970_v24 }
 0x25d   :  { %v894_v7 = vsel %vm886_vm8, %v877_v26, %v893_v50  ;;  %v898_v13 = vsel %vm886_vm8, %v880_v34, %v897_v52  ;;  %v891_v20 = vsel %vm885_vm7, %v888_v2, %v890_v4  ;;  %v977_v35 = vshrl.u32 %v2006_v32, %v971_v55 }
 0x25e   :  { %v895_v25 = vsel %vm885_vm7, %v892_v22, %v894_v7  ;;  %v899_v23 = vsel %vm885_vm7, %v896_v38, %v898_v13  ;;  %v975_v46 = vor.u32 %v974_v8, %v973_v51  ;;  %v979_v16 = vshll.u32 %v2006_v32, %v970_v24 }
 0x25f   :  { %v2608_v39 = vmul.u32.u64.low %v2576_v42, %v899_v23  ;;  %v2609_v41 = vmul.u32.u64.high %v2576_v42, %v899_v23, %v2608_v39  ;;  %v2612_v62 = vmul.u32.u64.low %v2576_v42, %v895_v25  ;;  %v2613_v21 = vmul.u32.u64.high %v2576_v42, %v895_v25, %v2612_v62 }
 0x260   :  { %v978_v11 = vor.u32 %v977_v35, %v976_v1  ;;  %v980_v18 = vshrl.u32 %v2007_v37, %v971_v55  ;;  %v972_v12 = vshrl.u32 %v2004_v28, %v971_v55  ;;  %v982_v9 = vshll.u32 %v2007_v37, %v970_v24 }
 0x261   :  { %v983_v19 = vshrl.u32 %v2008_v40, %v971_v55  ;;  %v986_v47 = vshrl.u32 %v2009_v43, %v971_v55  ;;  %v907_v14 = vmul.u32 %v2576_v42, %v891_v20  ;;  %v985_v31 = vshll.u32 %v2008_v40, %v970_v24 }
 0x262   :  { %v981_v27 = vor.u32 %v980_v18, %v979_v16  ;;  %vm988_vm11 = vcmp.lt.s32.totalorder %v2584_v53, 1  ;;  %vm909_vm12 = vc.u32 %v2609_v41, %v2612_v62  ;;  %v910_v29 = vadd.s32 1, %v2613_v21 }
 0x263   :  { %v984_v56 = vor.u32 %v983_v19, %v982_v9  ;;  %vm989_vm13 = vcmp.lt.s32.totalorder %v2584_v53, 2  ;;  %v987_v60 = vor.u32 %v986_v47, %v985_v31  ;;  %vm990_vm14 = vcmp.lt.s32.totalorder %v2584_v53, 3 }
 0x264   :  { %vm991_vm15 = vcmp.lt.s32.totalorder %v2584_v53, 4  ;;  %v996_v0 = vsel %vm988_vm11, %v975_v46, %v978_v11  ;;  %v911_v42 = vsel %vm909_vm12, %v910_v29, %v2613_v21  ;;  %v1000_v3 = vsel %vm988_vm11, %v978_v11, %v981_v27 }
 0x265   :  { %v993_v58 = vsel %vm991_vm15, %v981_v27, 2102212464  ;;  %v997_v24 = vsel %vm991_vm15, %v984_v56, 920167782  ;;  %v912_v57 = vadd.s32 %v911_v42, %v907_v14  ;;  %v992_v59 = vsel %vm988_vm11, %v972_v12, %v975_v46 }
 0x266   :  { %v998_v61 = vsel %vm990_vm14, %v981_v27, %v997_v24  ;;  %v1001_v15 = vsel %vm991_vm15, %v987_v60, 1326507024  ;;  %v994_v33 = vsel %vm990_vm14, %v978_v11, %v993_v58  ;;  %v1072_v34 = vsel %vm1071_vm10, %v2581_v17, 0 }
 0x267   :  { %v999_v26 = vsel %vm989_vm13, %v996_v0, %v998_v61  ;;  %v1002_v55 = vsel %vm990_vm14, %v984_v56, %v1001_v15  ;;  %v913_v63 = vadd.s32 536870912, %v912_v57  ;;  %v1167_v50 = vand.u32 2139095040, %v2574_v48 }
 0x268   :  { %v1003_v2 = vsel %vm989_vm13, %v1000_v3, %v1002_v55  ;;  %v2640_v36 = vmul.u32.u64.low %v2578_v44, %v999_v26  ;;  %v2641_v22 = vmul.u32.u64.high %v2578_v44, %v999_v26, %v2640_v36  ;;  %v995_v17 = vsel %vm989_vm13, %v992_v59, %v994_v33 }
 0x269   :  { %v2645_v38 = vmul.u32.u64.low %v2578_v44, %v1003_v2  ;;  %v2646_v4 = vmul.u32.u64.high %v2578_v44, %v1003_v2, %v2645_v38  ;;  %v2649_v52 = vshrl.u32 %v913_v63, 30  ;;  %v1067_v51 = vand.u32 8388607, %v1060_v49 }
 0x26a   :  { %v1074_v7 = vand.u32 31, %v1072_v34  ;;  %v1014_v13 = vadd.s32 1, %v2641_v22  ;;  %v1011_v20 = vmul.u32 %v2578_v44, %v995_v17  ;;  %v1168_v25 = vshrl.u32 %v1167_v50, 23 }
 0x26b   :  { %v915_v1 = vshll.u32 %v2649_v52, 30  ;;  %vm1013_vm0 = vc.u32 %v2646_v4, %v2640_v36  ;;  %v1068_v35 = vor.u32 8388608, %v1067_v51  ;;  %v1073_v11 = vshrl.u32 %v1072_v34, 5 }
 0x26c   :  { %v1075_v8 = vsub.s32 32, %v1074_v7  ;;  %v1015_v23 = vsel %vm1013_vm0, %v1014_v13, %v2641_v22  ;;  %v1077_v39 = vshll.u32 %v2004_v28, %v1074_v7  ;;  %v1080_v16 = vshll.u32 %v2005_v30, %v1074_v7 }
 0x26d   :  { %v1016_v53 = vadd.s32 %v1015_v23, %v1011_v20  ;;  %v1083_v18 = vshll.u32 %v2006_v32, %v1074_v7  ;;  %v2667_v12 = vsub.s32 %v912_v57, %v915_v1  ;;  %v1749_v47 = vadd.s32 4294967169, %v1168_v25 }
 0x26e   :  { %v1078_v21 = vshrl.u32 %v2005_v30, %v1075_v8  ;;  %v1081_v46 = vshrl.u32 %v2006_v32, %v1075_v8  ;;  %v1084_v44 = vshrl.u32 %v2007_v37, %v1075_v8  ;;  %v1086_v31 = vshll.u32 %v2007_v37, %v1074_v7 }
 0x26f   :  { %v1017_v9 = vadd.s32 536870912, %v1016_v53  ;;  %v1087_v29 = vshrl.u32 %v2008_v40, %v1075_v8  ;;  %v1089_v60 = vshll.u32 %v2008_v40, %v1074_v7  ;;  %v1090_v0 = vshrl.u32 %v2009_v43, %v1075_v8 }
 0x270   :  { %v1079_v19 = vor.u32 %v1078_v21, %v1077_v39  ;;  %v1082_v14 = vor.u32 %v1081_v46, %v1080_v16  ;;  %v1085_v27 = vor.u32 %v1084_v44, %v1083_v18  ;;  %vm1092_vm1 = vcmp.lt.s32.totalorder %v1073_v11, 1 }
 0x271   :  { %v2671_v56 = vshrl.u32 %v1017_v9, 30  ;;  %v1088_v42 = vor.u32 %v1087_v29, %v1086_v31  ;;  %vm1094_vm2 = vcmp.lt.s32.totalorder %v1073_v11, 3  ;;  %v1108_v58 = vshll.u32 %v1068_v35, 8 }
 0x272   :  { %v1091_v3 = vor.u32 %v1090_v0, %v1089_v60  ;;  %vm1095_vm3 = vcmp.lt.s32.totalorder %v1073_v11, 4  ;;  %v1174_v57 = vadd.s32 1, %v1749_v47  ;;  %v918_v59 = vsub.s32 0, %v2667_v12 }
 0x273   :  { %v1019_v24 = vshll.u32 %v2671_v56, 30  ;;  %v1100_v61 = vsel %vm1092_vm1, %v1079_v19, %v1082_v14  ;;  %v1101_v15 = vsel %vm1095_vm3, %v1088_v42, 920167782  ;;  %v1104_v33 = vsel %vm1092_vm1, %v1082_v14, %v1085_v27 }
 0x274   :  { %vm1093_vm4 = vcmp.lt.s32.totalorder %v1073_v11, 2  ;;  %v1102_v55 = vsel %vm1094_vm2, %v1085_v27, %v1101_v15  ;;  %v1105_v34 = vsel %vm1095_vm3, %v1091_v3, 1326507024  ;;  %v1076_v63 = vshrl.u32 %v2004_v28, %v1075_v8 }
 0x275   :  { %v2679_v26 = vsub.s32 %v1016_v53, %v1019_v24  ;;  %v1097_v2 = vsel %vm1095_vm3, %v1085_v27, 2102212464  ;;  %v1106_v22 = vsel %vm1094_vm2, %v1088_v42, %v1105_v34  ;;  %vm1175_vm5 = vcmp.gt.s32.totalorder %v1174_v57, 0 }
 0x276   :  { %v1103_v50 = vsel %vm1093_vm4, %v1100_v61, %v1102_v55  ;;  %v1107_v17 = vsel %vm1093_vm4, %v1104_v33, %v1106_v22  ;;  %v1176_v51 = vsel %vm1175_vm5, %v1174_v57, 0  ;;  %v1738_v7 = vmin.u32 %v918_v59, %v2667_v12 }
 0x277   :  { %v1022_v38 = vsub.s32 0, %v2679_v26  ;;  %v1096_v13 = vsel %vm1092_vm1, %v1076_v63, %v1079_v19  ;;  %v1098_v1 = vsel %vm1094_vm2, %v1082_v14, %v1097_v2  ;;  %v1178_v8 = vand.u32 31, %v1176_v51 }
 0x278   :  { %v2690_v20 = vmul.u32.u64.low %v1108_v58, %v1107_v17  ;;  %v2691_v25 = vmul.u32.u64.high %v1108_v58, %v1107_v17, %v2690_v20  ;;  %v2694_v35 = vmul.u32.u64.low %v1108_v58, %v1103_v50  ;;  %v2695_v53 = vmul.u32.u64.high %v1108_v58, %v1103_v50, %v2694_v35 }
 0x279   :  { %v1742_v23 = vmin.u32 %v1022_v38, %v2679_v26  ;;  %v1164_v39 = vand.u32 2147483647, %v2574_v48  ;;  %v1099_v21 = vsel %vm1093_vm4, %v1096_v13, %v1098_v1  ;;  %v920_v46 = vclz %v1738_v7 }
 0x27a   :  { %vm1117_vm6 = vc.u32 %v2691_v25, %v2694_v35  ;;  %v1179_v16 = vsub.s32 32, %v1178_v8  ;;  %v1118_v44 = vadd.s32 1, %v2695_v53  ;;  %v1115_v9 = vmul.u32 %v1108_v58, %v1099_v21 }
 0x27b   :  { %v1024_v18 = vclz %v1742_v23  ;;  %v1171_v19 = vand.u32 8388607, %v1164_v39  ;;  %v1739_v14 = vadd.s32 4294967294, %v920_v46  ;;  %v1181_v58 = vshll.u32 %v2004_v28, %v1178_v8 }
 0x27c   :  { %v1119_v47 = vsel %vm1117_vm6, %v1118_v44, %v2695_v53  ;;  %v1182_v31 = vshrl.u32 %v2005_v30, %v1179_v16  ;;  %v1185_v11 = vshrl.u32 %v2006_v32, %v1179_v16  ;;  %v1188_v60 = vshrl.u32 %v2007_v37, %v1179_v16 }
 0x27d   :  { %v1120_v27 = vadd.s32 %v1119_v47, %v1115_v9  ;;  %v1743_v29 = vadd.s32 4294967294, %v1024_v18  ;;  %v1191_v0 = vshrl.u32 %v2008_v40, %v1179_v16  ;;  %v1172_v24 = vor.u32 8388608, %v1171_v19 }
 0x27e   :  { %v1184_v3 = vshll.u32 %v2005_v30, %v1178_v8  ;;  %v1177_v57 = vshrl.u32 %v1176_v51, 5  ;;  %v1187_v59 = vshll.u32 %v2006_v32, %v1178_v8  ;;  %v1190_v61 = vshll.u32 %v2007_v37, %v1178_v8 }
 0x27f   :  { %v1121_v42 = vadd.s32 536870912, %v1120_v27  ;;  %v1194_v15 = vshrl.u32 %v2009_v43, %v1179_v16  ;;  %vm1740_vm7 = vcmp.lt.s32.totalorder %v1739_v14, 0  ;;  %v1183_v55 = vor.u32 %v1182_v31, %v1181_v58 }
 0x280   :  { %v1186_v34 = vor.u32 %v1185_v11, %v1184_v3  ;;  %vm1744_vm8 = vcmp.lt.s32.totalorder %v1743_v29, 0  ;;  %v1189_v63 = vor.u32 %v1188_v60, %v1187_v59  ;;  %v1192_v2 = vor.u32 %v1191_v0, %v1190_v61 }
 0x281   :  { %v2715_v33 = vshrl.u32 %v1121_v42, 30  ;;  %v1193_v22 = vshll.u32 %v2008_v40, %v1178_v8  ;;  %v923_v50 = vsel %vm1740_vm7, 0, %v1739_v14  ;;  %vm1196_vm9 = vcmp.lt.s32.totalorder %v1177_v57, 1 }
 0x282   :  { %v1212_v51 = vshll.u32 %v1172_v24, 8  ;;  %v1027_v7 = vsel %vm1744_vm8, 0, %v1743_v29  ;;  %vm1199_vm10 = vcmp.lt.s32.totalorder %v1177_v57, 4  ;;  %v1204_v1 = vsel %vm1196_vm9, %v1183_v55, %v1186_v34 }
 0x283   :  { %v1123_v38 = vshll.u32 %v2715_v33, 30  ;;  %v1195_v17 = vor.u32 %v1194_v15, %v1193_v22  ;;  %v1180_v20 = vshrl.u32 %v2004_v28, %v1179_v16  ;;  %vm1198_vm11 = vcmp.lt.s32.totalorder %v1177_v57, 3 }
 0x284   :  { %v1201_v23 = vsel %vm1199_vm10, %v1189_v63, 2102212464  ;;  %v1205_v53 = vsel %vm1199_vm10, %v1192_v2, 920167782  ;;  %vm1197_vm12 = vcmp.lt.s32.totalorder %v1177_v57, 2  ;;  %v1208_v46 = vsel %vm1196_vm9, %v1186_v34, %v1189_v63 }
 0x285   :  { %v2719_v13 = vsub.s32 %v1120_v27, %v1123_v38  ;;  %v1206_v8 = vsel %vm1198_vm11, %v1189_v63, %v1205_v53  ;;  %v928_v18 = vsub.s32 4294967266, %v923_v50  ;;  %v1032_v44 = vsub.s32 4294967266, %v1027_v7 }
 0x286   :  { %v1207_v9 = vsel %vm1197_vm12, %v1204_v1, %v1206_v8  ;;  %v1209_v19 = vsel %vm1199_vm10, %v1195_v17, 1326507024  ;;  %v1200_v14 = vsel %vm1196_vm9, %v1180_v20, %v1183_v55  ;;  %v1202_v27 = vsel %vm1198_vm11, %v1186_v34, %v1201_v23 }
 0x287   :  { %v1126_v21 = vsub.s32 0, %v2719_v13  ;;  %v1210_v16 = vsel %vm1198_vm11, %v1192_v2, %v1209_v19  ;;  %v2729_v11 = vmul.u32.u64.low %v1212_v51, %v1207_v9  ;;  %v2730_v29 = vmul.u32.u64.high %v1212_v51, %v1207_v9, %v2729_v11 }
 0x288   :  { %v1211_v31 = vsel %vm1197_vm12, %v1208_v46, %v1210_v16  ;;  %v929_v24 = vadd.s32 127, %v928_v18  ;;  %v1203_v58 = vsel %vm1197_vm12, %v1200_v14, %v1202_v27  ;;  %v1033_v3 = vadd.s32 127, %v1032_v44 }
 0x289   :  { %v1746_v47 = vmin.u32 %v1126_v21, %v2719_v13  ;;  %v2733_v0 = vmul.u32.u64.low %v1212_v51, %v1211_v31  ;;  %v2734_v42 = vmul.u32.u64.high %v1212_v51, %v1211_v31, %v2733_v0  ;;  %v908_v61 = vadd.s32 %v2612_v62, %v2609_v41 }
 0x28a   :  { %v924_v15 = vsub.s32 32, %v923_v50  ;;  %v1222_v55 = vadd.s32 1, %v2730_v29  ;;  %v1028_v34 = vsub.s32 32, %v1027_v7  ;;  %v1219_v63 = vmul.u32 %v1212_v51, %v1203_v58 }
 0x28b   :  { %v1128_v60 = vclz %v1746_v47  ;;  %vm1221_vm14 = vc.u32 %v2734_v42, %v2729_v11  ;;  %v930_v2 = vshll.u32 %v929_v24, 23  ;;  %v1012_v22 = vadd.s32 %v2640_v36, %v2646_v4 }
 0x28c   :  { %v1223_v38 = vsel %vm1221_vm14, %v1222_v55, %v2730_v29  ;;  %v1034_v17 = vshll.u32 %v1033_v3, 23  ;;  %v926_v62 = vshrl.u32 %v908_v61, %v924_v15  ;;  %v1116_v23 = vadd.s32 %v2694_v35, %v2691_v25 }
 0x28d   :  { %v1747_v59 = vadd.s32 4294967294, %v1128_v60  ;;  %v1224_v41 = vadd.s32 %v1223_v38, %v1219_v63  ;;  %v1030_v53 = vshrl.u32 %v1012_v22, %v1028_v34  ;;  %v925_v8 = vshll.u32 %v2667_v12, %v923_v50 }
 0x28e   :  { %v931_v46 = vor.u32 4788187, %v930_v2  ;;  %v1029_v36 = vshll.u32 %v2679_v26, %v1027_v7  ;;  %v1035_v4 = vor.u32 4788187, %v1034_v17  ;;  %vm854_vm15 = vcmp.lt.s32.totalorder %v2556_v5, 0 }
 0x28f   :  { %vm1748_vm13 = vcmp.lt.s32.totalorder %v1747_v59, 0  ;;  %v1225_v21 = vadd.s32 536870912, %v1224_v41  ;;  %v927_v19 = vor.u32 %v926_v62, %v925_v8  ;;  %vm958_vm1 = vcmp.lt.s32.totalorder %v2558_v6, 0 }
 0x290   :  { %v1131_v57 = vsel %vm1748_vm13, 0, %v1747_v59  ;;  %v1031_v14 = vor.u32 %v1030_v53, %v1029_v36  ;;  %v932_v35 = vand.u32 2147483647, %v931_v46  ;;  %v1036_v31 = vand.u32 2147483647, %v1035_v4 }
 0x291   :  { %v1132_v1 = vsub.s32 32, %v1131_v57  ;;  %v1136_v20 = vsub.s32 4294967266, %v1131_v57  ;;  %v2749_v9 = vshrl.u32 %v1225_v21, 30  ;;  %v1133_v47 = vshll.u32 %v2719_v13, %v1131_v57 }
 0x292   :  { %v934_v12 = vcvt.s32.f32 %v927_v19  ;;  %v1038_v60 = vcvt.s32.f32 %v1031_v14  ;;  %vm1062_vm2 = vcmp.lt.s32.totalorder %v2565_v10, 0  ;;  %v1220_v22 = vadd.s32 %v2729_v11, %v2734_v42 }
 0x293   :  { %v1137_v51 = vadd.s32 127, %v1136_v20  ;;  %v1134_v18 = vshrl.u32 %v1116_v23, %v1132_v1  ;;  %v1227_v25 = vshll.u32 %v2749_v9, 30  ;;  %vm2764_vm3 = vcmp.le.f32.partialorder %v852_v54, 0.7853982 }
 0x294   :  { %v935_v26 = vmul.f32 %v934_v12, %v932_v35  ;;  %v1039_v24 = vmul.f32 %v1038_v60, %v1036_v31  ;;  %vm2770_vm4 = vcmp.le.f32.partialorder %v956_v45, 0.7853982  ;;  %vm2784_vm5 = vcmp.le.f32.partialorder %v1060_v49, 0.7853982 }
 0x295   :  { %v1138_v44 = vshll.u32 %v1137_v51, 23  ;;  %v1135_v16 = vor.u32 %v1134_v18, %v1133_v47  ;;  %v1228_v29 = vsub.s32 %v1224_v41, %v1227_v25  ;;  %v1146_v21 = vsub.s32 4, %v2715_v33 }
 0x296   :  { %v936_v61 = vxor.u32 2147483648, %v935_v26  ;;  %v1040_v13 = vxor.u32 2147483648, %v1039_v24  ;;  %v1042_v46 = vsub.s32 4, %v2671_v56  ;;  %v938_v18 = vsub.s32 4, %v2649_v52 }
 0x297   :  { %v1139_v27 = vor.u32 4788187, %v1138_v44  ;;  %v1230_v0 = vsub.s32 0, %v1228_v29  ;;  %v1142_v7 = vcvt.s32.f32 %v1135_v16  ;;  %v1147_v4 = vsel %vm1062_vm2, %v1146_v21, %v2715_v33 }
 0x298   :  { %v937_v34 = vsel %vm854_vm15, %v936_v61, %v935_v26  ;;  %v1041_v2 = vsel %vm958_vm1, %v1040_v13, %v1039_v24  ;;  %v1250_v19 = vsub.s32 4, %v2749_v9  ;;  %v1043_v47 = vsel %vm958_vm1, %v1042_v46, %v2671_v56 }
 0x299   :  { %v1140_v50 = vand.u32 2147483647, %v1139_v27  ;;  %v1750_v58 = vmin.u32 %v1230_v0, %v1228_v29  ;;  %v940_v11 = vsel %vm2764_vm3, %v2556_v5, %v937_v34  ;;  %v1044_v54 = vsel %vm2770_vm4, %v2558_v6, %v1041_v2 }
 0x29a   :  { %1955 = vcosq.f32 %v940_v11  ;;  %v939_v14 = vsel %vm854_vm15, %v938_v18, %v2649_v52  ;;  %v1149_v25 = vsel %vm2784_vm5, 0, %v1147_v4  ;;  %vm1166_vm6 = vcmp.lt.s32.totalorder %v2574_v48, 0 }
 0x29b   :  { %v1143_v3 = vmul.f32 %v1142_v7, %v1140_v50  ;;  %v1232_v59 = vclz %v1750_v58  ;;  %1957 = vcosq.f32 %v1044_v54  ;;  %vm2809_vm7 = vcmp.le.f32.partialorder %v1164_v39, 0.7853982 }
 0x29c   :  { %v1045_v56 = vsel %vm2770_vm4, 0, %v1043_v47  ;;  %v1251_v16 = vsel %vm1166_vm6, %v1250_v19, %v2749_v9  ;;  %v941_v52 = vsel %vm2764_vm3, 0, %v939_v14  ;;  %v1153_v50 = vadd.s32 3, %v1149_v25 }
 0x29d   :  { %v1751_v15 = vadd.s32 4294967294, %v1232_v59  ;;  %v1144_v55 = vxor.u32 2147483648, %v1143_v3  ;;  %v1049_v60 = vadd.s32 3, %v1045_v56  ;;  %v1253_v0 = vsel %vm2809_vm7, 0, %v1251_v16 }
 0x29e   :  { %v945_v7 = vadd.s32 3, %v941_v52  ;;  %v1257_v58 = vadd.s32 3, %v1253_v0  ;;  %vm1152_vm4 = vweird.f32 %v2565_v10 }
 0x29f   :  { %vm1752_vm0 = vcmp.lt.s32.totalorder %v1751_v15, 0  ;;  %v1145_v20 = vsel %vm1062_vm2, %v1144_v55, %v1143_v3  ;;  %v1154_v3 = vand.u32 3, %v1153_v50  ;;  %v1050_v59 = vand.u32 3, %v1049_v60 }
 0x2a0   :  { %v1235_v63 = vsel %vm1752_vm0, 0, %v1751_v15  ;;  %v1148_v23 = vsel %vm2784_vm5, %v2565_v10, %v1145_v20  ;;  %v946_v34 = vand.u32 3, %v945_v7  ;;  %vm1048_vm5 = vweird.f32 %v2558_v6  ;;  %v1753_v10 = vld [vmem:[%s2935_s6] ss:$0 sm:$0xff]  ;;  %s2010_s6 = smov [#allocation2]  }
 0x2a1   :  { %v1236_v57 = vsub.s32 32, %v1235_v63  ;;  %v1240_v38 = vsub.s32 4294967266, %v1235_v63  ;;  %v1237_v42 = vshll.u32 %v1228_v29, %v1235_v63  ;;  %1959 = vcosq.f32 %v1148_v23  ;;  %s1661_s8 = sshll.u32 %s2010_s6, 4  ;;  %s1662_s8 = int_to_ptr.vmem [resolvable:$true] %s1661_s8 }
 0x2a2   :  { %1961 = vsinq.f32 %v1148_v23  ;;  %vm1156_vm8 = vcmp.eq.s32.totalorder %v1154_v3, 0  ;;  %vm1159_vm9 = vcmp.eq.s32.totalorder %v1154_v3, 2  ;;  %vm1052_vm10 = vcmp.eq.s32.totalorder %v1050_v59, 0  ;;  %s1979_s9 = scalar_lea.vmem %s1662_s8, 256  ;;  %p1984_p1 = scmp.lt.s32.totalorder %s1662_s8, %s1662_s8 }
 0x2a3   :  { %v1238_v41 = vshrl.u32 %v1220_v22, %v1236_v57  ;;  %v1241_v62 = vadd.s32 127, %v1240_v38  ;;  %1963 = vsinq.f32 %v1044_v54  ;;  %v1258_v22 = vand.u32 3, %v1257_v58  ;;  %p1980_p0 = scmp.ne.s32.totalorder %s1662_s8, %s1979_s9  ;;  %p1985_p2 = scmp.lt.s32.totalorder %s1979_s9, %s1979_s9 }
 0x2a4   :  { %1965 = vsinq.f32 %v940_v11  ;;  %v1956_v31 = vpop.eup %1955  ;;  %vm1055_vm11 = vcmp.eq.s32.totalorder %v1050_v59, 2  ;;  %vm948_vm12 = vcmp.eq.s32.totalorder %v946_v34, 0  ;;  %vm951_vm13 = vcmp.eq.s32.totalorder %v946_v34, 2 }
 0x2a5   :  { %v1239_v53 = vor.u32 %v1238_v41, %v1237_v42  ;;  %v1242_v51 = vshll.u32 %v1241_v62, 23  ;;  %v1958_v12 = vpop.eup %1957  ;;  %v952_v2 = vxor.u32 2147483648, %v1956_v31  ;;  %vm1155_vm14 = vcmp.lt.s32.totalorder %v1154_v3, 2  ;;  %p1986_p3 = por %p1985_p2, %p1984_p1 }
 0x2a6   :  { %v1056_v55 = vxor.u32 2147483648, %v1958_v12  ;;  %vm1051_vm15 = vcmp.lt.s32.totalorder %v1050_v59, 2  ;;  %vm1263_vm0 = vcmp.eq.s32.totalorder %v1258_v22, 2  ;;  %vm1260_vm1 = vcmp.eq.s32.totalorder %v1258_v22, 0 }
 0x2a7   :  { %v1243_v8 = vor.u32 4788187, %v1242_v51  ;;  %v1246_v36 = vcvt.s32.f32 %v1239_v53  ;;  %vm947_vm2 = vcmp.lt.s32.totalorder %v946_v34, 2  ;;  %vm1259_vm3 = vcmp.lt.s32.totalorder %v1258_v22, 2  ;;  %p1987_p4 = pnand %p1986_p3, %p1980_p0 }
 0x2a9   :  { %v1244_v49 = vand.u32 2147483647, %v1243_v8 }
 0x2ab   :  { %v1247_v44 = vmul.f32 %v1246_v36, %v1244_v49  ;;  %v1960_v39 = vpop.eup %1959 }
 0x2ac   :  { %v1962_v26 = vpop.eup %1961  ;;  %v1160_v13 = vxor.u32 2147483648, %v1960_v39 }
 0x2ad   :  { %v1248_v27 = vxor.u32 2147483648, %v1247_v44  ;;  %v1964_v9 = vpop.eup %1963  ;;  %v1157_v61 = vxor.u32 2147483648, %v1962_v26 }
 0x2ae   :  { %v1966_v24 = vpop.eup %1965  ;;  %v1053_v15 = vxor.u32 2147483648, %v1964_v9  ;;  %v1161_v38 = vsel %vm1159_vm9, %v1160_v13, %v1962_v26  ;;  %v1057_v20 = vsel %vm1055_vm11, %v1056_v55, %v1964_v9 }
 0x2af   :  { %v1249_v35 = vsel %vm1166_vm6, %v1248_v27, %v1247_v44  ;;  %v949_v63 = vxor.u32 2147483648, %v1966_v24  ;;  %v1158_v57 = vsel %vm1156_vm8, %v1960_v39, %v1157_v61  ;;  %v953_v62 = vsel %vm951_vm13, %v952_v2, %v1966_v24 }
 0x2b0   :  { %v1252_v29 = vsel %vm2809_vm7, %v2574_v48, %v1249_v35  ;;  %v1054_v1 = vsel %vm1052_vm10, %v1958_v12, %v1053_v15  ;;  %v1162_v45 = vsel %vm1155_vm14, %v1158_v57, %v1161_v38  ;;  %vm1256_vm6 = vweird.f32 %v2574_v48 }
 0x2b1   :  { %1967 = vcosq.f32 %v1252_v29  ;;  %v950_v41 = vsel %vm948_vm12, %v1956_v31, %v949_v63  ;;  %v1058_v23 = vsel %vm1051_vm15, %v1054_v1, %v1057_v20  ;;  %v1163_v46 = vsel %vm1152_vm4, nan, %v1162_v45 }
 0x2b2   :  { %1969 = vsinq.f32 %v1252_v29  ;;  %v954_v21 = vsel %vm947_vm2, %v950_v41, %v953_v62  ;;  %v1059_v18 = vsel %vm1048_vm5, nan, %v1058_v23  ;;  %vm944_vm7 = vweird.f32 %v2556_v5 }
 0x2b3   :  { %v955_v4 = vsel %vm944_vm7, nan, %v954_v21 }
 0x2b4   :  { %v1268_v44 = vpack.c.bf16 %v1163_v46, %v955_v4 }
 0x2bb   :  { %v1968_v17 = vpop.eup %1967 }
 0x2bc   :  { %v1970_v11 = vpop.eup %1969  ;;  %v1264_v42 = vxor.u32 2147483648, %v1968_v17 }
 0x2bd   :  { %v1261_v54 = vxor.u32 2147483648, %v1970_v11 }
 0x2be   :  { %v1265_v53 = vsel %vm1263_vm0, %v1264_v42, %v1970_v11 }
 0x2bf   :  { %v1262_v51 = vsel %vm1260_vm1, %v1968_v17, %v1261_v54 }
 0x2c0   :  { %v1266_v8 = vsel %vm1259_vm3, %v1262_v51, %v1265_v53 }
 0x2c1   :  { %v1267_v49 = vsel %vm1256_vm6, nan, %v1266_v8 }
 0x2c2   :  { %v1269_v36 = vpack.c.bf16 %v1267_v49, %v1059_v18 }
 0x2c4   :  { %1437 = vmatprep.mubr.bf16.mxu0 %v1269_v36 }
 0x2c5   :  { %1438 = vmatmul.mubr.bf16.vlgmr.msra.gmra.mrb[4].mxu0 %v1268_v44 }
 0x398   :  { %v1794_v19 = vpop.f32.mrb[4].mxu0 }
 0x399   :  { %v1795_v47 = vpop.f32.mrb[5].mxu0 }
 0x39a   :  { %v1796_v6 = vadd.f32 %v1795_v47, %v1794_v19  ;;  %v1797_v14 = vpop.f32.mrb[6].mxu0 }
 0x39b   :  { %v1798_v48 = vpop.f32.mrb[7].mxu0 }
 0x39c   :  { %v2830_v27 = vadd.f32 %v1796_v6, %v1753_v10  ;;  %v1799_v25 = vadd.f32 %v1798_v48, %v1797_v14 }
 0x39e   :  { %v1446_v33 = vand.u32 2147483647, %v2830_v27  ;;  %v1449_v5 = vand.u32 2139095040, %v2830_v27  ;;  %v2834_v35 = vadd.f32 %v1799_v25, %v1753_v10  ;;  %vm1448_vm7 = vcmp.lt.s32.totalorder %v2830_v27, 0 }
 0x3a0   :  { %v1450_v56 = vshrl.u32 %v1449_v5, 23  ;;  %v1453_v16 = vand.u32 8388607, %v1446_v33  ;;  %v1553_v31 = vand.u32 2139095040, %v2834_v35  ;;  %v1550_v29 = vand.u32 2147483647, %v2834_v35 }
 0x3a1   :  { %vm1447_vm6 = vcmp.le.f32.partialorder %v1446_v33, 0.7853982 }
 0x3a2   :  { %v1770_v52 = vadd.s32 4294967169, %v1450_v56  ;;  %v1554_v12 = vshrl.u32 %v1553_v31, 23  ;;  %v1454_v39 = vor.u32 8388608, %v1453_v16  ;;  %v1557_v0 = vand.u32 8388607, %v1550_v29 }
 0x3a4   :  { %v1456_v50 = vadd.s32 1, %v1770_v52  ;;  %v1774_v60 = vadd.s32 4294967169, %v1554_v12  ;;  %v2842_v58 = vshll.u32 %v1454_v39, 8  ;;  %v1558_v61 = vor.u32 8388608, %v1557_v0 }
 0x3a6   :  { %vm1457_vm8 = vcmp.gt.s32.totalorder %v1456_v50, 0  ;;  %v1560_v7 = vadd.s32 1, %v1774_v60  ;;  %v1598_v4 = vshll.u32 %v1558_v61, 8 }
 0x3a7   :  { %v1458_v26 = vsel %vm1457_vm8, %v1456_v50, 0  ;;  %vm1552_vm8 = vcmp.lt.s32.totalorder %v2834_v35, 0 }
 0x3a8   :  { %v1459_v9 = vshrl.u32 %v1458_v26, 5  ;;  %v1460_v24 = vand.u32 31, %v1458_v26  ;;  %vm1561_vm9 = vcmp.gt.s32.totalorder %v1560_v7, 0 }
 0x3a9   :  { %v1562_v42 = vsel %vm1561_vm9, %v1560_v7, 0  ;;  %vm2906_vm9 = vcmp.le.f32.partialorder %v1550_v29, 0.7853982 }
 0x3aa   :  { %v1461_v3 = vsub.s32 32, %v1460_v24  ;;  %v1463_v59 = vshll.u32 %v2004_v28, %v1460_v24  ;;  %v1466_v13 = vshll.u32 %v2005_v30, %v1460_v24  ;;  %v1469_v15 = vshll.u32 %v2006_v32, %v1460_v24 }
 0x3ab   :  { %v1472_v55 = vshll.u32 %v2007_v37, %v1460_v24  ;;  %v1475_v34 = vshll.u32 %v2008_v40, %v1460_v24  ;;  %vm1478_vm10 = vcmp.lt.s32.totalorder %v1459_v9, 1  ;;  %vm1480_vm11 = vcmp.lt.s32.totalorder %v1459_v9, 3 }
 0x3ac   :  { %v1464_v63 = vshrl.u32 %v2005_v30, %v1461_v3  ;;  %v1467_v2 = vshrl.u32 %v2006_v32, %v1461_v3  ;;  %v1470_v22 = vshrl.u32 %v2007_v37, %v1461_v3  ;;  %v1462_v57 = vshrl.u32 %v2004_v28, %v1461_v3 }
 0x3ad   :  { %v1473_v38 = vshrl.u32 %v2008_v40, %v1461_v3  ;;  %v1476_v17 = vshrl.u32 %v2009_v43, %v1461_v3  ;;  %vm1481_vm12 = vcmp.lt.s32.totalorder %v1459_v9, 4  ;;  %v1564_v54 = vand.u32 31, %v1562_v42 }
 0x3ae   :  { %v1465_v1 = vor.u32 %v1464_v63, %v1463_v59  ;;  %v1468_v20 = vor.u32 %v1467_v2, %v1466_v13  ;;  %v1471_v11 = vor.u32 %v1470_v22, %v1469_v15  ;;  %vm1479_vm13 = vcmp.lt.s32.totalorder %v1459_v9, 2 }
 0x3af   :  { %v1474_v41 = vor.u32 %v1473_v38, %v1472_v55  ;;  %v1477_v62 = vor.u32 %v1476_v17, %v1475_v34  ;;  %v1565_v18 = vsub.s32 32, %v1564_v54  ;;  %v1563_v47 = vshrl.u32 %v1562_v42, 5 }
 0x3b0   :  { %v1482_v45 = vsel %vm1478_vm10, %v1462_v57, %v1465_v1  ;;  %v1483_v23 = vsel %vm1481_vm12, %v1471_v11, 2102212464  ;;  %v1486_v53 = vsel %vm1478_vm10, %v1465_v1, %v1468_v20  ;;  %v1490_v51 = vsel %vm1478_vm10, %v1468_v20, %v1471_v11 }
 0x3b1   :  { %v1484_v21 = vsel %vm1480_vm11, %v1468_v20, %v1483_v23  ;;  %v1487_v8 = vsel %vm1481_vm12, %v1474_v41, 920167782  ;;  %v1491_v46 = vsel %vm1481_vm12, %v1477_v62, 1326507024  ;;  %v1567_v5 = vshll.u32 %v2004_v28, %v1564_v54 }
 0x3b2   :  { %v1488_v49 = vsel %vm1480_vm11, %v1471_v11, %v1487_v8  ;;  %v1492_v36 = vsel %vm1480_vm11, %v1474_v41, %v1491_v46  ;;  %v1485_v44 = vsel %vm1479_vm13, %v1482_v45, %v1484_v21  ;;  %v1568_v56 = vshrl.u32 %v2005_v30, %v1565_v18 }
 0x3b3   :  { %v1489_v19 = vsel %vm1479_vm13, %v1486_v53, %v1488_v49  ;;  %v1493_v10 = vsel %vm1479_vm13, %v1490_v51, %v1492_v36  ;;  %v1570_v16 = vshll.u32 %v2005_v30, %v1564_v54  ;;  %v1571_v31 = vshrl.u32 %v2006_v32, %v1565_v18 }
 0x3b4   :  { %v2863_v6 = vmul.u32.u64.low %v2842_v58, %v1493_v10  ;;  %v2864_v14 = vmul.u32.u64.high %v2842_v58, %v1493_v10, %v2863_v6  ;;  %v2867_v48 = vmul.u32.u64.low %v2842_v58, %v1489_v19  ;;  %v2868_v25 = vmul.u32.u64.high %v2842_v58, %v1489_v19, %v2867_v48 }
 0x3b5   :  { %v1573_v52 = vshll.u32 %v2006_v32, %v1564_v54  ;;  %v1574_v12 = vshrl.u32 %v2007_v37, %v1565_v18  ;;  %v1576_v50 = vshll.u32 %v2007_v37, %v1564_v54  ;;  %v1577_v39 = vshrl.u32 %v2008_v40, %v1565_v18 }
 0x3b6   :  { %v1569_v60 = vor.u32 %v1568_v56, %v1567_v5  ;;  %v1572_v0 = vor.u32 %v1571_v31, %v1570_v16  ;;  %v1579_v26 = vshll.u32 %v2008_v40, %v1564_v54  ;;  %v1580_v7 = vshrl.u32 %v2009_v43, %v1565_v18 }
 0x3b7   :  { %v1501_v9 = vmul.u32 %v2842_v58, %v1485_v44  ;;  %vm1503_vm14 = vc.u32 %v2864_v14, %v2867_v48  ;;  %v1504_v30 = vadd.s32 1, %v2868_v25  ;;  %v1575_v32 = vor.u32 %v1574_v12, %v1573_v52 }
 0x3b8   :  { %v1566_v24 = vshrl.u32 %v2004_v28, %v1565_v18  ;;  %v1578_v3 = vor.u32 %v1577_v39, %v1576_v50  ;;  %v1581_v37 = vor.u32 %v1580_v7, %v1579_v26  ;;  %vm1582_vm15 = vcmp.lt.s32.totalorder %v1563_v47, 1 }
 0x3b9   :  { %v1505_v59 = vsel %vm1503_vm14, %v1504_v30, %v2868_v25  ;;  %vm1584_vm0 = vcmp.lt.s32.totalorder %v1563_v47, 3  ;;  %vm1585_vm1 = vcmp.lt.s32.totalorder %v1563_v47, 4  ;;  %v1590_v40 = vsel %vm1582_vm15, %v1569_v60, %v1572_v0 }
 0x3ba   :  { %v1506_v61 = vadd.s32 %v1505_v59, %v1501_v9  ;;  %v1587_v43 = vsel %vm1585_vm1, %v1575_v32, 2102212464  ;;  %v1591_v13 = vsel %vm1585_vm1, %v1578_v3, 920167782  ;;  %v1594_v58 = vsel %vm1582_vm15, %v1572_v0, %v1575_v32 }
 0x3bb   :  { %vm1583_vm2 = vcmp.lt.s32.totalorder %v1563_v47, 2  ;;  %v1586_v15 = vsel %vm1582_vm15, %v1566_v24, %v1569_v60  ;;  %v1592_v55 = vsel %vm1584_vm0, %v1575_v32, %v1591_v13  ;;  %v1595_v34 = vsel %vm1585_vm1, %v1581_v37, 1326507024 }
 0x3bc   :  { %v1507_v63 = vadd.s32 536870912, %v1506_v61  ;;  %v1588_v2 = vsel %vm1584_vm0, %v1572_v0, %v1587_v43  ;;  %v1593_v22 = vsel %vm1583_vm2, %v1590_v40, %v1592_v55  ;;  %v1596_v28 = vsel %vm1584_vm0, %v1578_v3, %v1595_v34 }
 0x3bd   :  { %v1597_v57 = vsel %vm1583_vm2, %v1594_v58, %v1596_v28  ;;  %v2887_v38 = vmul.u32.u64.low %v1598_v4, %v1593_v22  ;;  %v2888_v17 = vmul.u32.u64.high %v1598_v4, %v1593_v22, %v2887_v38  ;;  %v1589_v42 = vsel %vm1583_vm2, %v1586_v15, %v1588_v2 }
 0x3be   :  { %v1508_v1 = vshrl.u32 %v1507_v63, 30  ;;  %v2890_v20 = vmul.u32.u64.low %v1598_v4, %v1597_v57  ;;  %v2891_v11 = vmul.u32.u64.high %v1598_v4, %v1597_v57, %v2890_v20  ;;  %v1605_v45 = vmul.u32 %v1598_v4, %v1589_v42 }
 0x3bf   :  { %v1608_v62 = vadd.s32 1, %v2888_v17  ;;  %v1502_v10 = vadd.s32 %v2867_v48, %v2864_v14  ;;  %vm1538_vm13 = vweird.f32 %v2830_v27  ;;  %vm1642_vm1 = vweird.f32 %v2834_v35 }
 0x3c0   :  { %v1509_v41 = vshll.u32 %v1508_v1, 30  ;;  %vm1607_vm3 = vc.u32 %v2891_v11, %v2887_v38  ;;  %v1532_v26 = vsub.s32 4, %v1508_v1  ;;  %v1606_v14 = vadd.s32 %v2887_v38, %v2891_v11 }
 0x3c1   :  { %v1609_v23 = vsel %vm1607_vm3, %v1608_v62, %v2888_v17 }
 0x3c2   :  { %v1510_v54 = vsub.s32 %v1506_v61, %v1509_v41  ;;  %v1610_v51 = vadd.s32 %v1609_v23, %v1605_v45  ;;  %v1533_v40 = vsel %vm1448_vm7, %v1532_v26, %v1508_v1 }
 0x3c3   :  { %v1535_v15 = vsel %vm1447_vm6, 0, %v1533_v40 }
 0x3c4   :  { %v1512_v53 = vsub.s32 0, %v1510_v54  ;;  %v1611_v8 = vadd.s32 536870912, %v1610_v51  ;;  %v1539_v22 = vadd.s32 3, %v1535_v15 }
 0x3c6   :  { %v1771_v21 = vmin.u32 %v1512_v53, %v1510_v54  ;;  %v1612_v18 = vshrl.u32 %v1611_v8, 30  ;;  %v1540_v17 = vand.u32 3, %v1539_v22 }
 0x3c8   :  { %v1514_v46 = vclz %v1771_v21  ;;  %v1613_v36 = vshll.u32 %v1612_v18, 30  ;;  %v1636_v2 = vsub.s32 4, %v1612_v18  ;;  %vm1545_vm10 = vcmp.eq.s32.totalorder %v1540_v17, 2 }
 0x3c9   :  { %vm1542_vm11 = vcmp.eq.s32.totalorder %v1540_v17, 0  ;;  %vm1541_vm12 = vcmp.lt.s32.totalorder %v1540_v17, 2 }
 0x3ca   :  { %v1772_v49 = vadd.s32 4294967294, %v1514_v46  ;;  %v1614_v44 = vsub.s32 %v1610_v51, %v1613_v36  ;;  %v1637_v38 = vsel %vm1552_vm8, %v1636_v2, %v1612_v18 }
 0x3cb   :  { %v1639_v41 = vsel %vm2906_vm9, 0, %v1637_v38 }
 0x3cc   :  { %vm1773_vm4 = vcmp.lt.s32.totalorder %v1772_v49, 0  ;;  %v1616_v6 = vsub.s32 0, %v1614_v44  ;;  %v1643_v45 = vadd.s32 3, %v1639_v41 }
 0x3cd   :  { %v1517_v19 = vsel %vm1773_vm4, 0, %v1772_v49 }
 0x3ce   :  { %v1518_v47 = vsub.s32 32, %v1517_v19  ;;  %v1522_v4 = vsub.s32 4294967266, %v1517_v19  ;;  %v1519_v25 = vshll.u32 %v1510_v54, %v1517_v19  ;;  %v1775_v16 = vmin.u32 %v1616_v6, %v1614_v44 }
 0x3cf   :  { %v1644_v51 = vand.u32 3, %v1643_v45 }
 0x3d0   :  { %v1520_v5 = vshrl.u32 %v1502_v10, %v1518_v47  ;;  %v1523_v56 = vadd.s32 127, %v1522_v4  ;;  %v1618_v12 = vclz %v1775_v16 }
 0x3d1   :  { %vm1649_vm14 = vcmp.eq.s32.totalorder %v1644_v51, 2  ;;  %vm1646_vm15 = vcmp.eq.s32.totalorder %v1644_v51, 0  ;;  %vm1645_vm0 = vcmp.lt.s32.totalorder %v1644_v51, 2 }
 0x3d2   :  { %v1521_v31 = vor.u32 %v1520_v5, %v1519_v25  ;;  %v1524_v52 = vshll.u32 %v1523_v56, 23  ;;  %v1776_v39 = vadd.s32 4294967294, %v1618_v12 }
 0x3d4   :  { %v1525_v50 = vor.u32 4788187, %v1524_v52  ;;  %v1528_v0 = vcvt.s32.f32 %v1521_v31  ;;  %vm1777_vm5 = vcmp.lt.s32.totalorder %v1776_v39, 0 }
 0x3d5   :  { %v1621_v7 = vsel %vm1777_vm5, 0, %v1776_v39 }
 0x3d6   :  { %v1526_v60 = vand.u32 2147483647, %v1525_v50  ;;  %v1622_v48 = vsub.s32 32, %v1621_v7  ;;  %v1626_v30 = vsub.s32 4294967266, %v1621_v7  ;;  %v1623_v24 = vshll.u32 %v1614_v44, %v1621_v7 }
 0x3d8   :  { %v1529_v9 = vmul.f32 %v1528_v0, %v1526_v60  ;;  %v1624_v3 = vshrl.u32 %v1606_v14, %v1622_v48  ;;  %v1627_v37 = vadd.s32 127, %v1626_v30 }
 0x3da   :  { %v1530_v32 = vxor.u32 2147483648, %v1529_v9  ;;  %v1625_v61 = vor.u32 %v1624_v3, %v1623_v24  ;;  %v1628_v43 = vshll.u32 %v1627_v37, 23 }
 0x3dc   :  { %v1531_v59 = vsel %vm1448_vm7, %v1530_v32, %v1529_v9  ;;  %v1629_v58 = vor.u32 4788187, %v1628_v43  ;;  %v1632_v34 = vcvt.s32.f32 %v1625_v61 }
 0x3dd   :  { %v1534_v13 = vsel %vm1447_vm6, %v2830_v27, %v1531_v59 }
 0x3de   :  { %1971 = vcosq.f32 %v1534_v13  ;;  %v1630_v55 = vand.u32 2147483647, %v1629_v58 }
 0x3df   :  { %1973 = vsinq.f32 %v1534_v13 }
 0x3e0   :  { %v1633_v63 = vmul.f32 %v1632_v34, %v1630_v55 }
 0x3e2   :  { %v1634_v28 = vxor.u32 2147483648, %v1633_v63 }
 0x3e4   :  { %v1635_v57 = vsel %vm1552_vm8, %v1634_v28, %v1633_v63 }
 0x3e5   :  { %v1638_v1 = vsel %vm2906_vm9, %v2834_v35, %v1635_v57 }
 0x3e6   :  { %1975 = vcosq.f32 %v1638_v1 }
 0x3e7   :  { %1977 = vsinq.f32 %v1638_v1 }
 0x3e8   :  { %v1972_v20 = vpop.eup %1971 }
 0x3e9   :  { %v1974_v11 = vpop.eup %1973  ;;  %v1546_v42 = vxor.u32 2147483648, %v1972_v20 }
 0x3ea   :  { %v1543_v62 = vxor.u32 2147483648, %v1974_v11 }
 0x3eb   :  { %v1547_v29 = vsel %vm1545_vm10, %v1546_v42, %v1974_v11 }
 0x3ec   :  { %v1544_v54 = vsel %vm1542_vm11, %v1972_v20, %v1543_v62 }
 0x3ed   :  { %v1548_v23 = vsel %vm1541_vm12, %v1544_v54, %v1547_v29 }
 0x3ee   :  { %v1549_v53 = vsel %vm1538_vm13, nan, %v1548_v23 }
 0x3ef   :  { %1654 = vst [vmem:[#allocation2] sm:$0xff] %v1549_v53 }
 0x3f0   :  { %v1976_v21 = vpop.eup %1975 }
 0x3f1   :  { %v1978_v8 = vpop.eup %1977  ;;  %v1650_v46 = vxor.u32 2147483648, %v1976_v21 }
 0x3f2   :  { %v1647_v18 = vxor.u32 2147483648, %v1978_v8 }
 0x3f3   :  { %v1651_v49 = vsel %vm1649_vm14, %v1650_v46, %v1978_v8 }
 0x3f4   :  { %v1648_v36 = vsel %vm1646_vm15, %v1976_v21, %v1647_v18 }
 0x3f5   :  { %v1652_v44 = vsel %vm1645_vm0, %v1648_v36, %v1651_v49 }
 0x3f6   :  { %v1653_v27 = vsel %vm1642_vm1, nan, %v1652_v44 }
 0x3f7   :  { %1655 = vst [vmem:[#allocation2 + $0x8] sm:$0xff] %v1653_v27 }
 0x3f8   :  { %1990 = shalt.err (!%p1987_p4)
}
 0x3f9   :  { %s1991_s12 = scalar_lea.hbm %s2936_s7, 256 }
 0x3fa   :  { %p1992_p5 = scmp.ne.s32.totalorder %s2936_s7, %s1991_s12  ;;  %p1995_p6 = scmp.lt.u32.totalorder %s1991_s12, %s2936_s7 }
 0x3fc   :  { %p1997_p7 = pnand %p1995_p6, %p1992_p5 }
 0x3fe   :  { %2000 = shalt.err (!%p1997_p7)
}
 0x3ff   :  { %s2011_s16 = smov 128   ;;  %s2012_s17 = smov 8  }
 0x400   :  { %1667 = dma.vmem_to_hbm [thread:$0]  %s1662_s8, 256, %s2936_s7, [#allocation3], %s2011_s16, %s2011_s16, %s2012_s17  }
 0x401   :  { %2001 = dma.done.wait [#allocation3], 256  }
 0x402   :  { %2002 = vsyncadd [#allocation3], 4294967040 }
 0x403   :  { %1671 = vsyncpa [#allocation3], 1 }

</bundles_post_ra>
